<compile_context>
chip_gen: v7x
topology: tpu7x:2x2x1
jax: 0.10.0
libtpu: 0.0.40
codegen_flags: <defaults>
</compile_context>

<pallas_src>
import jax
import jax.numpy as jnp
from jax.experimental import pallas as pl
from jax.experimental.pallas import tpu as pltpu

# Scaled-down constants (original: EMB_DIM = HIDDEN_DIM = 512).
EMB_DIM = 128
HIDDEN_DIM = 128
INPUT_SIZE = HIDDEN_DIM + EMB_DIM   # x_t feature dim implied by VisualSentinel.W_x
BATCH = 8
SEQ_LEN = 8

# Matmul-operand dtype (weights and the x/h operands fed to the MXU). Gate math is f32.
MATMUL_DTYPE = jnp.bfloat16


def extended_lstm_seq_kernel(x_ref, h0_ref, c0_ref, w1_ref, w2_ref, b_ref,
                             out_ref, pre_scr):
    """Whole-sequence fused LSTMCell + VisualSentinel (single invocation).

    x_ref  : (T*B, IN) bf16   flattened sequence input
    h0_ref : (B, H) f32       initial hidden
    c0_ref : (B, H) f32       initial cell
    w1_ref : (IN, 5H) bf16    packed [i | f | o | sentinel | g] input weights
    w2_ref : (H, 5H) bf16     packed [i | f | o | sentinel | g] recurrent weights
    b_ref  : (1, 5H) f32      fused bias (zeros in the sentinel column)
    out_ref: (T, B, 3H) f32   per-step [s_t | h_t | c_t], split in the wrapper
    pre_scr: (T*B, 5H) f32    VMEM scratch for the hoisted input projection
    """
    T, B, H3 = out_ref.shape
    H = H3 // 3
    H4 = 4 * H

    # Hoisted input projection for ALL timesteps: one big MXU matmul, bias folded in.
    pre_scr[...] = (jnp.dot(x_ref[...], w1_ref[...],
                            preferred_element_type=jnp.float32)
                    + b_ref[...])

    w2 = w2_ref[...]            # (H, 5H) bf16, VMEM-resident

    def step(t, carry):
        h_prev, c_prev = carry                     # h bf16, c f32 (vreg-carried)
        row = pl.multiple_of(t * B, B)
        pre = pre_scr[pl.ds(row, B), :] + jnp.dot(
            h_prev, w2, preferred_element_type=jnp.float32)   # (B, 5H) f32

        sig = jax.nn.sigmoid(pre[:, :H4])          # one wide sigmoid: [i | f | o | s]
        g_g = jnp.tanh(pre[:, H4:])                # candidate gate
        i_g = sig[:, 0:H]
        f_g = sig[:, H:2 * H]
        o_g = sig[:, 2 * H:3 * H]
        g_s = sig[:, 3 * H:H4]                     # sentinel gate (no bias column)

        c_new = f_g * c_prev + i_g * g_g
        tanh_c = jnp.tanh(c_new)                   # computed once, reused twice
        h_new = o_g * tanh_c
        s_t = g_s * tanh_c

        # One lane-dense (B, 3H) store per step instead of three (B, H) stores.
        out_ref[t] = jnp.concatenate([s_t, h_new, c_new],
                                     axis=-1).astype(out_ref.dtype)
        return (h_new.astype(w2.dtype), c_new)

    jax.lax.fori_loop(0, T, step,
                      (h0_ref[...].astype(w2.dtype), c0_ref[...]),
                      unroll=True)


def pack_params(params, matmul_dtype=MATMUL_DTYPE):
    """One-time weight prep: transpose, gate reorder [i|f|o|s|g], bias fusion, cast."""
    H = params["w_hh"].shape[1]
    wih_t = params["w_ih"].T     # (IN, 4H), columns ordered [i | f | g | o] (PyTorch)
    whh_t = params["w_hh"].T     # (H, 4H)

    def reorder(w4, w_sent):
        # -> [i | f | o | sentinel | g] so all sigmoid gates are contiguous.
        return jnp.concatenate(
            [w4[:, 0:H], w4[:, H:2 * H], w4[:, 3 * H:4 * H], w_sent,
             w4[:, 2 * H:3 * H]], axis=1)

    w1 = reorder(wih_t, params["w_x"]).astype(matmul_dtype)
    w2 = reorder(whh_t, params["w_h"]).astype(matmul_dtype)

    b4 = params["b_ih"] + params["b_hh"]           # [i | f | g | o]
    bias = jnp.concatenate(
        [b4[0:H], b4[H:2 * H], b4[3 * H:4 * H], jnp.zeros((H,), jnp.float32),
         b4[2 * H:3 * H]]).reshape(1, 5 * H).astype(jnp.float32)
    return {"w1": w1, "w2": w2, "bias": bias}


@jax.jit
def extended_lstm_seq(x_seq, h0, c0, packed):
    """Run the ExtendedLSTM cell over a whole (T, B, INPUT_SIZE) sequence."""
    T, B, IN = x_seq.shape
    H = h0.shape[-1]
    w1, w2, bias = packed["w1"], packed["w2"], packed["bias"]

    # Cast once (dtype downcast only) and flatten so the input projection is one matmul.
    x_flat = x_seq.reshape(T * B, IN).astype(w1.dtype)

    full2 = lambda i: (0, 0)
    full3 = lambda i: (0, 0, 0)

    out = pl.pallas_call(
        extended_lstm_seq_kernel,
        out_shape=jax.ShapeDtypeStruct((T, B, 3 * H), jnp.float32),
        grid=(1,),
        in_specs=[
            pl.BlockSpec((T * B, IN), full2),       # x (flattened, bf16)
            pl.BlockSpec((B, H), full2),            # h0
            pl.BlockSpec((B, H), full2),            # c0
            pl.BlockSpec(w1.shape, full2),          # W1 (VMEM-resident)
            pl.BlockSpec(w2.shape, full2),          # W2 (VMEM-resident)
            pl.BlockSpec((1, 5 * H), full2),        # fused bias
        ],
        out_specs=pl.BlockSpec((T, B, 3 * H), full3),
        scratch_shapes=[pltpu.VMEM((T * B, 5 * H), jnp.float32)],  # pre-activations
        compiler_params=pltpu.CompilerParams(
            dimension_semantics=("arbitrary",)),
    )(x_flat, h0, c0, w1, w2, bias)

    s_seq = out[..., 0:H]
    h_seq = out[..., H:2 * H]
    c_seq = out[..., 2 * H:3 * H]
    return s_seq, h_seq, c_seq


def extended_lstm(x_t, prev_hidden, prev_cell, packed):
    """Single-step API matching the PyTorch module's forward signature."""
    s_seq, h_seq, c_seq = extended_lstm_seq(x_t[None], prev_hidden, prev_cell, packed)
    return s_seq[0], h_seq[0], c_seq[0]


# ----------------------------- pure-JAX references -----------------------------
def extended_lstm_ref_step(x_t, h, c, params, matmul_dtype=jnp.float32):
    """Reference matching torch.nn.LSTMCell + VisualSentinel.

    matmul_dtype=float32 -> exact f32 module semantics; bfloat16 -> emulates the
    kernel's matmul precision (bf16 operands, f32 accumulation).
    """
    H = h.shape[-1]
    xm = x_t.astype(matmul_dtype)
    hm = h.astype(matmul_dtype)
    gates = (jnp.dot(xm, params["w_ih"].T.astype(matmul_dtype),
                     preferred_element_type=jnp.float32)
             + jnp.dot(hm, params["w_hh"].T.astype(matmul_dtype),
                       preferred_element_type=jnp.float32)
             + params["b_ih"] + params["b_hh"])
    i_g = jax.nn.sigmoid(gates[:, 0 * H:1 * H])
    f_g = jax.nn.sigmoid(gates[:, 1 * H:2 * H])
    g_g = jnp.tanh(gates[:, 2 * H:3 * H])
    o_g = jax.nn.sigmoid(gates[:, 3 * H:4 * H])
    c_new = f_g * c + i_g * g_g
    h_new = o_g * jnp.tanh(c_new)
    g_t = jax.nn.sigmoid(
        jnp.dot(xm, params["w_x"].astype(matmul_dtype),
                preferred_element_type=jnp.float32)
        + jnp.dot(hm, params["w_h"].astype(matmul_dtype),
                  preferred_element_type=jnp.float32))
    s_t = g_t * jnp.tanh(c_new)
    return s_t, h_new, c_new


def extended_lstm_ref_seq(x_seq, h0, c0, params, matmul_dtype=jnp.float32):
    def step(carry, x_t):
        h, c = carry
        s_t, h_new, c_new = extended_lstm_ref_step(x_t, h, c, params, matmul_dtype)
        return (h_new, c_new), (s_t, h_new, c_new)
    _, (s, hs, cs) = jax.lax.scan(step, (h0, c0), x_seq)
    return s, hs, cs


def init_params(key, input_size, hidden_size):
    """Deterministic parameter init (shapes as in the PyTorch module __init__)."""
    k = 1.0 / jnp.sqrt(hidden_size)
    ks = jax.random.split(key, 6)
    return {
        # nn.LSTMCell: uniform(-1/sqrt(H), 1/sqrt(H))
        "w_ih": jax.random.uniform(ks[0], (4 * hidden_size, input_size), jnp.float32, -k, k),
        "w_hh": jax.random.uniform(ks[1], (4 * hidden_size, hidden_size), jnp.float32, -k, k),
        "b_ih": jax.random.uniform(ks[2], (4 * hidden_size,), jnp.float32, -k, k),
        "b_hh": jax.random.uniform(ks[3], (4 * hidden_size,), jnp.float32, -k, k),
        # VisualSentinel: torch.randn (scaled so the sigmoid isn't saturated at this size)
        "w_x": jax.random.normal(ks[4], (input_size, hidden_size), jnp.float32) * 0.02,
        "w_h": jax.random.normal(ks[5], (hidden_size, hidden_size), jnp.float32) * 0.02,
    }


if __name__ == "__main__":
    key = jax.random.PRNGKey(0)
    k_p, k_x, k_h, k_c = jax.random.split(key, 4)

    params = init_params(k_p, INPUT_SIZE, HIDDEN_DIM)
    packed = pack_params(params)        # one-time weight prep (hoisted out of the step)

    x_seq = jax.random.normal(k_x, (SEQ_LEN, BATCH, INPUT_SIZE), jnp.float32)
    prev_h = jax.random.normal(k_h, (BATCH, HIDDEN_DIM), jnp.float32)
    prev_c = jax.random.normal(k_c, (BATCH, HIDDEN_DIM), jnp.float32)

    # --- fused whole-sequence kernel ---
    s_seq, h_seq, c_seq = extended_lstm_seq(x_seq, prev_h, prev_c, packed)
    jax.block_until_ready((s_seq, h_seq, c_seq))

    # Check vs. a precision-matched reference (same bf16 matmul operands).
    s_e, h_e, c_e = extended_lstm_ref_seq(x_seq, prev_h, prev_c, params,
                                          matmul_dtype=MATMUL_DTYPE)
    assert jnp.allclose(s_seq, s_e, atol=1e-2, rtol=1e-2)
    assert jnp.allclose(h_seq, h_e, atol=1e-2, rtol=1e-2)
    assert jnp.allclose(c_seq, c_e, atol=1e-2, rtol=1e-2)

    # Looser sanity check vs. the exact f32 module semantics (bf16 weight quantization).
    s_f, h_f, c_f = extended_lstm_ref_seq(x_seq, prev_h, prev_c, params,
                                          matmul_dtype=jnp.float32)
    assert jnp.allclose(s_seq, s_f, atol=6e-2, rtol=6e-2)
    assert jnp.allclose(h_seq, h_f, atol=6e-2, rtol=6e-2)
    assert jnp.allclose(c_seq, c_f, atol=6e-2, rtol=6e-2)

    # --- single-step API (matches the PyTorch forward signature) ---
    s_t, curr_h, curr_c = extended_lstm(x_seq[0], prev_h, prev_c, packed)
    jax.block_until_ready((s_t, curr_h, curr_c))
    s1, h1, c1 = extended_lstm_ref_step(x_seq[0], prev_h, prev_c, params,
                                        matmul_dtype=MATMUL_DTYPE)
    assert jnp.allclose(s_t, s1, atol=1e-2, rtol=1e-2)
    assert jnp.allclose(curr_h, h1, atol=1e-2, rtol=1e-2)
    assert jnp.allclose(curr_c, c1, atol=1e-2, rtol=1e-2)

    print("KERNEL_OK")
</pallas_src>

<mosaic_0001>
module attributes {stable_mosaic.version = 11 : i64} {
  func.func @extended_lstm_seq_kernel(%arg0: i32, %arg1: memref<64x256xbf16, #tpu.memory_space<vmem>>, %arg2: memref<8x128xf32, #tpu.memory_space<vmem>>, %arg3: memref<8x128xf32, #tpu.memory_space<vmem>>, %arg4: memref<256x640xbf16, #tpu.memory_space<vmem>>, %arg5: memref<128x640xbf16, #tpu.memory_space<vmem>>, %arg6: memref<1x640xf32, #tpu.memory_space<vmem>>, %arg7: memref<8x8x384xf32, #tpu.memory_space<vmem>>, %arg8: memref<64x640xf32, #tpu.memory_space<vmem>>) attributes {dimension_semantics = [#tpu.dimension_semantics<arbitrary>], iteration_bounds = array<i64: 1>, scalar_prefetch = 0 : i64, scratch_operands = 1 : i64, tpu.core_type = #tpu.core_type<tc>, window_params = [{pipeline_mode = #tpu.pipeline_mode<synchronous>, transform_indices = @transform_0, window_bounds = array<i64: 64, 256>}, {pipeline_mode = #tpu.pipeline_mode<synchronous>, transform_indices = @transform_1, window_bounds = array<i64: 8, 128>}, {pipeline_mode = #tpu.pipeline_mode<synchronous>, transform_indices = @transform_2, window_bounds = array<i64: 8, 128>}, {pipeline_mode = #tpu.pipeline_mode<synchronous>, transform_indices = @transform_3, window_bounds = array<i64: 256, 640>}, {pipeline_mode = #tpu.pipeline_mode<synchronous>, transform_indices = @transform_4, window_bounds = array<i64: 128, 640>}, {pipeline_mode = #tpu.pipeline_mode<synchronous>, transform_indices = @transform_5, window_bounds = array<i64: 1, 640>}, {pipeline_mode = #tpu.pipeline_mode<synchronous>, transform_indices = @transform_6, window_bounds = array<i64: 8, 8, 384>}]} {
    %c0 = arith.constant 0 : index
    %c0_0 = arith.constant 0 : index
    %0 = vector.load %arg1[%c0, %c0_0] : memref<64x256xbf16, #tpu.memory_space<vmem>>, vector<64x256xbf16>
    %c0_1 = arith.constant 0 : index
    %c0_2 = arith.constant 0 : index
    %1 = vector.load %arg4[%c0_1, %c0_2] : memref<256x640xbf16, #tpu.memory_space<vmem>>, vector<256x640xbf16>
    %cst = arith.constant dense<0.000000e+00> : vector<64x640xf32>
    %2 = tpu.matmul %0, %1, %cst {dimension_numbers = #tpu.dot_dimension_numbers<[1], [0], [0], [1], [0, 0, 1, 1], [], []>} : vector<64x256xbf16>, vector<256x640xbf16>, vector<64x640xf32> -> vector<64x640xf32>
    %c0_3 = arith.constant 0 : index
    %c0_4 = arith.constant 0 : index
    %3 = vector.load %arg6[%c0_3, %c0_4] : memref<1x640xf32, #tpu.memory_space<vmem>>, vector<1x640xf32>
    %4 = vector.broadcast %3 : vector<1x640xf32> to vector<64x640xf32>
    %5 = arith.addf %2, %4 : vector<64x640xf32>
    %c0_5 = arith.constant 0 : index
    %c0_6 = arith.constant 0 : index
    %6 = vector.load %arg8[%c0_5, %c0_6] : memref<64x640xf32, #tpu.memory_space<vmem>>, vector<64x640xf32>
    tpu.vector_store %arg8[%c0_5, %c0_6], %5 {strides = array<i32>} : memref<64x640xf32, #tpu.memory_space<vmem>>, vector<64x640xf32>,
    %c0_7 = arith.constant 0 : index
    %c0_8 = arith.constant 0 : index
    %7 = vector.load %arg5[%c0_7, %c0_8] : memref<128x640xbf16, #tpu.memory_space<vmem>>, vector<128x640xbf16>
    %c0_9 = arith.constant 0 : index
    %c0_10 = arith.constant 0 : index
    %8 = vector.load %arg2[%c0_9, %c0_10] : memref<8x128xf32, #tpu.memory_space<vmem>>, vector<8x128xf32>
    %9 = arith.truncf %8 : vector<8x128xf32> to vector<8x128xbf16>
    %c0_11 = arith.constant 0 : index
    %c0_12 = arith.constant 0 : index
    %10 = vector.load %arg3[%c0_11, %c0_12] : memref<8x128xf32, #tpu.memory_space<vmem>>, vector<8x128xf32>
    %c0_i32 = arith.constant 0 : i32
    %c8_i32 = arith.constant 8 : i32
    %11 = arith.muli %c0_i32, %c8_i32 : i32
    %12 = tpu.assume_multiple %11, 8 : i32
    %13 = arith.index_cast %12 : i32 to index
    %c0_13 = arith.constant 0 : index
    %14 = vector.load %arg8[%13, %c0_13] : memref<64x640xf32, #tpu.memory_space<vmem>>, vector<8x640xf32>
    %cst_14 = arith.constant dense<0.000000e+00> : vector<8x640xf32>
    %15 = tpu.matmul %9, %7, %cst_14 {dimension_numbers = #tpu.dot_dimension_numbers<[1], [0], [0], [1], [0, 0, 1, 1], [], []>} : vector<8x128xbf16>, vector<128x640xbf16>, vector<8x640xf32> -> vector<8x640xf32>
    %16 = arith.addf %14, %15 : vector<8x640xf32>
    %17 = vector.extract_strided_slice %16 {offsets = [0, 0], sizes = [8, 512], strides = [1, 1]} : vector<8x640xf32> to vector<8x512xf32>
    %18 = arith.negf %17 : vector<8x512xf32>
    %19 = math.exp %18 : vector<8x512xf32>
    %cst_15 = arith.constant 1.000000e+00 : f32
    %20 = vector.broadcast %cst_15 : f32 to vector<8x512xf32>
    %21 = arith.addf %20, %19 : vector<8x512xf32>
    %22 = arith.divf %20, %21 : vector<8x512xf32>
    %23 = vector.extract_strided_slice %16 {offsets = [0, 512], sizes = [8, 128], strides = [1, 1]} : vector<8x640xf32> to vector<8x128xf32>
    %24 = math.tanh %23 : vector<8x128xf32>
    %25 = vector.extract_strided_slice %22 {offsets = [0, 0], sizes = [8, 128], strides = [1, 1]} : vector<8x512xf32> to vector<8x128xf32>
    %26 = vector.extract_strided_slice %22 {offsets = [0, 128], sizes = [8, 128], strides = [1, 1]} : vector<8x512xf32> to vector<8x128xf32>
    %27 = vector.extract_strided_slice %22 {offsets = [0, 256], sizes = [8, 128], strides = [1, 1]} : vector<8x512xf32> to vector<8x128xf32>
    %28 = vector.extract_strided_slice %22 {offsets = [0, 384], sizes = [8, 128], strides = [1, 1]} : vector<8x512xf32> to vector<8x128xf32>
    %29 = arith.mulf %26, %10 : vector<8x128xf32>
    %30 = arith.mulf %25, %24 : vector<8x128xf32>
    %31 = arith.addf %29, %30 : vector<8x128xf32>
    %32 = math.tanh %31 : vector<8x128xf32>
    %33 = arith.mulf %27, %32 : vector<8x128xf32>
    %34 = arith.mulf %28, %32 : vector<8x128xf32>
    %35 = tpu.concatenate %34, %33, %31 in 1 : vector<8x128xf32>, vector<8x128xf32>, vector<8x128xf32> -> vector<8x384xf32>
    %36 = arith.index_cast %c0_i32 : i32 to index
    %c0_16 = arith.constant 0 : index
    %c0_17 = arith.constant 0 : index
    %37 = vector.load %arg7[%36, %c0_16, %c0_17] : memref<8x8x384xf32, #tpu.memory_space<vmem>>, vector<1x8x384xf32>
    %38 = vector.shape_cast %37 : vector<1x8x384xf32> to vector<8x384xf32>
    %39 = vector.shape_cast %35 : vector<8x384xf32> to vector<1x8x384xf32>
    tpu.vector_store %arg7[%36, %c0_16, %c0_17], %39 {strides = array<i32>} : memref<8x8x384xf32, #tpu.memory_space<vmem>>, vector<1x8x384xf32>,
    %40 = arith.truncf %33 : vector<8x128xf32> to vector<8x128xbf16>
    %c1_i32 = arith.constant 1 : i32
    %c8_i32_18 = arith.constant 8 : i32
    %41 = arith.muli %c1_i32, %c8_i32_18 : i32
    %42 = tpu.assume_multiple %41, 8 : i32
    %43 = arith.index_cast %42 : i32 to index
    %c0_19 = arith.constant 0 : index
    %44 = vector.load %arg8[%43, %c0_19] : memref<64x640xf32, #tpu.memory_space<vmem>>, vector<8x640xf32>
    %cst_20 = arith.constant dense<0.000000e+00> : vector<8x640xf32>
    %45 = tpu.matmul %40, %7, %cst_20 {dimension_numbers = #tpu.dot_dimension_numbers<[1], [0], [0], [1], [0, 0, 1, 1], [], []>} : vector<8x128xbf16>, vector<128x640xbf16>, vector<8x640xf32> -> vector<8x640xf32>
    %46 = arith.addf %44, %45 : vector<8x640xf32>
    %47 = vector.extract_strided_slice %46 {offsets = [0, 0], sizes = [8, 512], strides = [1, 1]} : vector<8x640xf32> to vector<8x512xf32>
    %48 = arith.negf %47 : vector<8x512xf32>
    %49 = math.exp %48 : vector<8x512xf32>
    %cst_21 = arith.constant 1.000000e+00 : f32
    %50 = vector.broadcast %cst_21 : f32 to vector<8x512xf32>
    %51 = arith.addf %50, %49 : vector<8x512xf32>
    %52 = arith.divf %50, %51 : vector<8x512xf32>
    %53 = vector.extract_strided_slice %46 {offsets = [0, 512], sizes = [8, 128], strides = [1, 1]} : vector<8x640xf32> to vector<8x128xf32>
    %54 = math.tanh %53 : vector<8x128xf32>
    %55 = vector.extract_strided_slice %52 {offsets = [0, 0], sizes = [8, 128], strides = [1, 1]} : vector<8x512xf32> to vector<8x128xf32>
    %56 = vector.extract_strided_slice %52 {offsets = [0, 128], sizes = [8, 128], strides = [1, 1]} : vector<8x512xf32> to vector<8x128xf32>
    %57 = vector.extract_strided_slice %52 {offsets = [0, 256], sizes = [8, 128], strides = [1, 1]} : vector<8x512xf32> to vector<8x128xf32>
    %58 = vector.extract_strided_slice %52 {offsets = [0, 384], sizes = [8, 128], strides = [1, 1]} : vector<8x512xf32> to vector<8x128xf32>
    %59 = arith.mulf %56, %31 : vector<8x128xf32>
    %60 = arith.mulf %55, %54 : vector<8x128xf32>
    %61 = arith.addf %59, %60 : vector<8x128xf32>
    %62 = math.tanh %61 : vector<8x128xf32>
    %63 = arith.mulf %57, %62 : vector<8x128xf32>
    %64 = arith.mulf %58, %62 : vector<8x128xf32>
    %65 = tpu.concatenate %64, %63, %61 in 1 : vector<8x128xf32>, vector<8x128xf32>, vector<8x128xf32> -> vector<8x384xf32>
    %66 = arith.index_cast %c1_i32 : i32 to index
    %c0_22 = arith.constant 0 : index
    %c0_23 = arith.constant 0 : index
    %67 = vector.load %arg7[%66, %c0_22, %c0_23] : memref<8x8x384xf32, #tpu.memory_space<vmem>>, vector<1x8x384xf32>
    %68 = vector.shape_cast %67 : vector<1x8x384xf32> to vector<8x384xf32>
    %69 = vector.shape_cast %65 : vector<8x384xf32> to vector<1x8x384xf32>
    tpu.vector_store %arg7[%66, %c0_22, %c0_23], %69 {strides = array<i32>} : memref<8x8x384xf32, #tpu.memory_space<vmem>>, vector<1x8x384xf32>,
    %70 = arith.truncf %63 : vector<8x128xf32> to vector<8x128xbf16>
    %c2_i32 = arith.constant 2 : i32
    %c8_i32_24 = arith.constant 8 : i32
    %71 = arith.muli %c2_i32, %c8_i32_24 : i32
    %72 = tpu.assume_multiple %71, 8 : i32
    %73 = arith.index_cast %72 : i32 to index
    %c0_25 = arith.constant 0 : index
    %74 = vector.load %arg8[%73, %c0_25] : memref<64x640xf32, #tpu.memory_space<vmem>>, vector<8x640xf32>
    %cst_26 = arith.constant dense<0.000000e+00> : vector<8x640xf32>
    %75 = tpu.matmul %70, %7, %cst_26 {dimension_numbers = #tpu.dot_dimension_numbers<[1], [0], [0], [1], [0, 0, 1, 1], [], []>} : vector<8x128xbf16>, vector<128x640xbf16>, vector<8x640xf32> -> vector<8x640xf32>
    %76 = arith.addf %74, %75 : vector<8x640xf32>
    %77 = vector.extract_strided_slice %76 {offsets = [0, 0], sizes = [8, 512], strides = [1, 1]} : vector<8x640xf32> to vector<8x512xf32>
    %78 = arith.negf %77 : vector<8x512xf32>
    %79 = math.exp %78 : vector<8x512xf32>
    %cst_27 = arith.constant 1.000000e+00 : f32
    %80 = vector.broadcast %cst_27 : f32 to vector<8x512xf32>
    %81 = arith.addf %80, %79 : vector<8x512xf32>
    %82 = arith.divf %80, %81 : vector<8x512xf32>
    %83 = vector.extract_strided_slice %76 {offsets = [0, 512], sizes = [8, 128], strides = [1, 1]} : vector<8x640xf32> to vector<8x128xf32>
    %84 = math.tanh %83 : vector<8x128xf32>
    %85 = vector.extract_strided_slice %82 {offsets = [0, 0], sizes = [8, 128], strides = [1, 1]} : vector<8x512xf32> to vector<8x128xf32>
    %86 = vector.extract_strided_slice %82 {offsets = [0, 128], sizes = [8, 128], strides = [1, 1]} : vector<8x512xf32> to vector<8x128xf32>
    %87 = vector.extract_strided_slice %82 {offsets = [0, 256], sizes = [8, 128], strides = [1, 1]} : vector<8x512xf32> to vector<8x128xf32>
    %88 = vector.extract_strided_slice %82 {offsets = [0, 384], sizes = [8, 128], strides = [1, 1]} : vector<8x512xf32> to vector<8x128xf32>
    %89 = arith.mulf %86, %61 : vector<8x128xf32>
    %90 = arith.mulf %85, %84 : vector<8x128xf32>
    %91 = arith.addf %89, %90 : vector<8x128xf32>
    %92 = math.tanh %91 : vector<8x128xf32>
    %93 = arith.mulf %87, %92 : vector<8x128xf32>
    %94 = arith.mulf %88, %92 : vector<8x128xf32>
    %95 = tpu.concatenate %94, %93, %91 in 1 : vector<8x128xf32>, vector<8x128xf32>, vector<8x128xf32> -> vector<8x384xf32>
    %96 = arith.index_cast %c2_i32 : i32 to index
    %c0_28 = arith.constant 0 : index
    %c0_29 = arith.constant 0 : index
    %97 = vector.load %arg7[%96, %c0_28, %c0_29] : memref<8x8x384xf32, #tpu.memory_space<vmem>>, vector<1x8x384xf32>
    %98 = vector.shape_cast %97 : vector<1x8x384xf32> to vector<8x384xf32>
    %99 = vector.shape_cast %95 : vector<8x384xf32> to vector<1x8x384xf32>
    tpu.vector_store %arg7[%96, %c0_28, %c0_29], %99 {strides = array<i32>} : memref<8x8x384xf32, #tpu.memory_space<vmem>>, vector<1x8x384xf32>,
    %100 = arith.truncf %93 : vector<8x128xf32> to vector<8x128xbf16>
    %c3_i32 = arith.constant 3 : i32
    %c8_i32_30 = arith.constant 8 : i32
    %101 = arith.muli %c3_i32, %c8_i32_30 : i32
    %102 = tpu.assume_multiple %101, 8 : i32
    %103 = arith.index_cast %102 : i32 to index
    %c0_31 = arith.constant 0 : index
    %104 = vector.load %arg8[%103, %c0_31] : memref<64x640xf32, #tpu.memory_space<vmem>>, vector<8x640xf32>
    %cst_32 = arith.constant dense<0.000000e+00> : vector<8x640xf32>
    %105 = tpu.matmul %100, %7, %cst_32 {dimension_numbers = #tpu.dot_dimension_numbers<[1], [0], [0], [1], [0, 0, 1, 1], [], []>} : vector<8x128xbf16>, vector<128x640xbf16>, vector<8x640xf32> -> vector<8x640xf32>
    %106 = arith.addf %104, %105 : vector<8x640xf32>
    %107 = vector.extract_strided_slice %106 {offsets = [0, 0], sizes = [8, 512], strides = [1, 1]} : vector<8x640xf32> to vector<8x512xf32>
    %108 = arith.negf %107 : vector<8x512xf32>
    %109 = math.exp %108 : vector<8x512xf32>
    %cst_33 = arith.constant 1.000000e+00 : f32
    %110 = vector.broadcast %cst_33 : f32 to vector<8x512xf32>
    %111 = arith.addf %110, %109 : vector<8x512xf32>
    %112 = arith.divf %110, %111 : vector<8x512xf32>
    %113 = vector.extract_strided_slice %106 {offsets = [0, 512], sizes = [8, 128], strides = [1, 1]} : vector<8x640xf32> to vector<8x128xf32>
    %114 = math.tanh %113 : vector<8x128xf32>
    %115 = vector.extract_strided_slice %112 {offsets = [0, 0], sizes = [8, 128], strides = [1, 1]} : vector<8x512xf32> to vector<8x128xf32>
    %116 = vector.extract_strided_slice %112 {offsets = [0, 128], sizes = [8, 128], strides = [1, 1]} : vector<8x512xf32> to vector<8x128xf32>
    %117 = vector.extract_strided_slice %112 {offsets = [0, 256], sizes = [8, 128], strides = [1, 1]} : vector<8x512xf32> to vector<8x128xf32>
    %118 = vector.extract_strided_slice %112 {offsets = [0, 384], sizes = [8, 128], strides = [1, 1]} : vector<8x512xf32> to vector<8x128xf32>
    %119 = arith.mulf %116, %91 : vector<8x128xf32>
    %120 = arith.mulf %115, %114 : vector<8x128xf32>
    %121 = arith.addf %119, %120 : vector<8x128xf32>
    %122 = math.tanh %121 : vector<8x128xf32>
    %123 = arith.mulf %117, %122 : vector<8x128xf32>
    %124 = arith.mulf %118, %122 : vector<8x128xf32>
    %125 = tpu.concatenate %124, %123, %121 in 1 : vector<8x128xf32>, vector<8x128xf32>, vector<8x128xf32> -> vector<8x384xf32>
    %126 = arith.index_cast %c3_i32 : i32 to index
    %c0_34 = arith.constant 0 : index
    %c0_35 = arith.constant 0 : index
    %127 = vector.load %arg7[%126, %c0_34, %c0_35] : memref<8x8x384xf32, #tpu.memory_space<vmem>>, vector<1x8x384xf32>
    %128 = vector.shape_cast %127 : vector<1x8x384xf32> to vector<8x384xf32>
    %129 = vector.shape_cast %125 : vector<8x384xf32> to vector<1x8x384xf32>
    tpu.vector_store %arg7[%126, %c0_34, %c0_35], %129 {strides = array<i32>} : memref<8x8x384xf32, #tpu.memory_space<vmem>>, vector<1x8x384xf32>,
    %130 = arith.truncf %123 : vector<8x128xf32> to vector<8x128xbf16>
    %c4_i32 = arith.constant 4 : i32
    %c8_i32_36 = arith.constant 8 : i32
    %131 = arith.muli %c4_i32, %c8_i32_36 : i32
    %132 = tpu.assume_multiple %131, 8 : i32
    %133 = arith.index_cast %132 : i32 to index
    %c0_37 = arith.constant 0 : index
    %134 = vector.load %arg8[%133, %c0_37] : memref<64x640xf32, #tpu.memory_space<vmem>>, vector<8x640xf32>
    %cst_38 = arith.constant dense<0.000000e+00> : vector<8x640xf32>
    %135 = tpu.matmul %130, %7, %cst_38 {dimension_numbers = #tpu.dot_dimension_numbers<[1], [0], [0], [1], [0, 0, 1, 1], [], []>} : vector<8x128xbf16>, vector<128x640xbf16>, vector<8x640xf32> -> vector<8x640xf32>
    %136 = arith.addf %134, %135 : vector<8x640xf32>
    %137 = vector.extract_strided_slice %136 {offsets = [0, 0], sizes = [8, 512], strides = [1, 1]} : vector<8x640xf32> to vector<8x512xf32>
    %138 = arith.negf %137 : vector<8x512xf32>
    %139 = math.exp %138 : vector<8x512xf32>
    %cst_39 = arith.constant 1.000000e+00 : f32
    %140 = vector.broadcast %cst_39 : f32 to vector<8x512xf32>
    %141 = arith.addf %140, %139 : vector<8x512xf32>
    %142 = arith.divf %140, %141 : vector<8x512xf32>
    %143 = vector.extract_strided_slice %136 {offsets = [0, 512], sizes = [8, 128], strides = [1, 1]} : vector<8x640xf32> to vector<8x128xf32>
    %144 = math.tanh %143 : vector<8x128xf32>
    %145 = vector.extract_strided_slice %142 {offsets = [0, 0], sizes = [8, 128], strides = [1, 1]} : vector<8x512xf32> to vector<8x128xf32>
    %146 = vector.extract_strided_slice %142 {offsets = [0, 128], sizes = [8, 128], strides = [1, 1]} : vector<8x512xf32> to vector<8x128xf32>
    %147 = vector.extract_strided_slice %142 {offsets = [0, 256], sizes = [8, 128], strides = [1, 1]} : vector<8x512xf32> to vector<8x128xf32>
    %148 = vector.extract_strided_slice %142 {offsets = [0, 384], sizes = [8, 128], strides = [1, 1]} : vector<8x512xf32> to vector<8x128xf32>
    %149 = arith.mulf %146, %121 : vector<8x128xf32>
    %150 = arith.mulf %145, %144 : vector<8x128xf32>
    %151 = arith.addf %149, %150 : vector<8x128xf32>
    %152 = math.tanh %151 : vector<8x128xf32>
    %153 = arith.mulf %147, %152 : vector<8x128xf32>
    %154 = arith.mulf %148, %152 : vector<8x128xf32>
    %155 = tpu.concatenate %154, %153, %151 in 1 : vector<8x128xf32>, vector<8x128xf32>, vector<8x128xf32> -> vector<8x384xf32>
    %156 = arith.index_cast %c4_i32 : i32 to index
    %c0_40 = arith.constant 0 : index
    %c0_41 = arith.constant 0 : index
    %157 = vector.load %arg7[%156, %c0_40, %c0_41] : memref<8x8x384xf32, #tpu.memory_space<vmem>>, vector<1x8x384xf32>
    %158 = vector.shape_cast %157 : vector<1x8x384xf32> to vector<8x384xf32>
    %159 = vector.shape_cast %155 : vector<8x384xf32> to vector<1x8x384xf32>
    tpu.vector_store %arg7[%156, %c0_40, %c0_41], %159 {strides = array<i32>} : memref<8x8x384xf32, #tpu.memory_space<vmem>>, vector<1x8x384xf32>,
    %160 = arith.truncf %153 : vector<8x128xf32> to vector<8x128xbf16>
    %c5_i32 = arith.constant 5 : i32
    %c8_i32_42 = arith.constant 8 : i32
    %161 = arith.muli %c5_i32, %c8_i32_42 : i32
    %162 = tpu.assume_multiple %161, 8 : i32
    %163 = arith.index_cast %162 : i32 to index
    %c0_43 = arith.constant 0 : index
    %164 = vector.load %arg8[%163, %c0_43] : memref<64x640xf32, #tpu.memory_space<vmem>>, vector<8x640xf32>
    %cst_44 = arith.constant dense<0.000000e+00> : vector<8x640xf32>
    %165 = tpu.matmul %160, %7, %cst_44 {dimension_numbers = #tpu.dot_dimension_numbers<[1], [0], [0], [1], [0, 0, 1, 1], [], []>} : vector<8x128xbf16>, vector<128x640xbf16>, vector<8x640xf32> -> vector<8x640xf32>
    %166 = arith.addf %164, %165 : vector<8x640xf32>
    %167 = vector.extract_strided_slice %166 {offsets = [0, 0], sizes = [8, 512], strides = [1, 1]} : vector<8x640xf32> to vector<8x512xf32>
    %168 = arith.negf %167 : vector<8x512xf32>
    %169 = math.exp %168 : vector<8x512xf32>
    %cst_45 = arith.constant 1.000000e+00 : f32
    %170 = vector.broadcast %cst_45 : f32 to vector<8x512xf32>
    %171 = arith.addf %170, %169 : vector<8x512xf32>
    %172 = arith.divf %170, %171 : vector<8x512xf32>
    %173 = vector.extract_strided_slice %166 {offsets = [0, 512], sizes = [8, 128], strides = [1, 1]} : vector<8x640xf32> to vector<8x128xf32>
    %174 = math.tanh %173 : vector<8x128xf32>
    %175 = vector.extract_strided_slice %172 {offsets = [0, 0], sizes = [8, 128], strides = [1, 1]} : vector<8x512xf32> to vector<8x128xf32>
    %176 = vector.extract_strided_slice %172 {offsets = [0, 128], sizes = [8, 128], strides = [1, 1]} : vector<8x512xf32> to vector<8x128xf32>
    %177 = vector.extract_strided_slice %172 {offsets = [0, 256], sizes = [8, 128], strides = [1, 1]} : vector<8x512xf32> to vector<8x128xf32>
    %178 = vector.extract_strided_slice %172 {offsets = [0, 384], sizes = [8, 128], strides = [1, 1]} : vector<8x512xf32> to vector<8x128xf32>
    %179 = arith.mulf %176, %151 : vector<8x128xf32>
    %180 = arith.mulf %175, %174 : vector<8x128xf32>
    %181 = arith.addf %179, %180 : vector<8x128xf32>
    %182 = math.tanh %181 : vector<8x128xf32>
    %183 = arith.mulf %177, %182 : vector<8x128xf32>
    %184 = arith.mulf %178, %182 : vector<8x128xf32>
    %185 = tpu.concatenate %184, %183, %181 in 1 : vector<8x128xf32>, vector<8x128xf32>, vector<8x128xf32> -> vector<8x384xf32>
    %186 = arith.index_cast %c5_i32 : i32 to index
    %c0_46 = arith.constant 0 : index
    %c0_47 = arith.constant 0 : index
    %187 = vector.load %arg7[%186, %c0_46, %c0_47] : memref<8x8x384xf32, #tpu.memory_space<vmem>>, vector<1x8x384xf32>
    %188 = vector.shape_cast %187 : vector<1x8x384xf32> to vector<8x384xf32>
    %189 = vector.shape_cast %185 : vector<8x384xf32> to vector<1x8x384xf32>
    tpu.vector_store %arg7[%186, %c0_46, %c0_47], %189 {strides = array<i32>} : memref<8x8x384xf32, #tpu.memory_space<vmem>>, vector<1x8x384xf32>,
    %190 = arith.truncf %183 : vector<8x128xf32> to vector<8x128xbf16>
    %c6_i32 = arith.constant 6 : i32
    %c8_i32_48 = arith.constant 8 : i32
    %191 = arith.muli %c6_i32, %c8_i32_48 : i32
    %192 = tpu.assume_multiple %191, 8 : i32
    %193 = arith.index_cast %192 : i32 to index
    %c0_49 = arith.constant 0 : index
    %194 = vector.load %arg8[%193, %c0_49] : memref<64x640xf32, #tpu.memory_space<vmem>>, vector<8x640xf32>
    %cst_50 = arith.constant dense<0.000000e+00> : vector<8x640xf32>
    %195 = tpu.matmul %190, %7, %cst_50 {dimension_numbers = #tpu.dot_dimension_numbers<[1], [0], [0], [1], [0, 0, 1, 1], [], []>} : vector<8x128xbf16>, vector<128x640xbf16>, vector<8x640xf32> -> vector<8x640xf32>
    %196 = arith.addf %194, %195 : vector<8x640xf32>
    %197 = vector.extract_strided_slice %196 {offsets = [0, 0], sizes = [8, 512], strides = [1, 1]} : vector<8x640xf32> to vector<8x512xf32>
    %198 = arith.negf %197 : vector<8x512xf32>
    %199 = math.exp %198 : vector<8x512xf32>
    %cst_51 = arith.constant 1.000000e+00 : f32
    %200 = vector.broadcast %cst_51 : f32 to vector<8x512xf32>
    %201 = arith.addf %200, %199 : vector<8x512xf32>
    %202 = arith.divf %200, %201 : vector<8x512xf32>
    %203 = vector.extract_strided_slice %196 {offsets = [0, 512], sizes = [8, 128], strides = [1, 1]} : vector<8x640xf32> to vector<8x128xf32>
    %204 = math.tanh %203 : vector<8x128xf32>
    %205 = vector.extract_strided_slice %202 {offsets = [0, 0], sizes = [8, 128], strides = [1, 1]} : vector<8x512xf32> to vector<8x128xf32>
    %206 = vector.extract_strided_slice %202 {offsets = [0, 128], sizes = [8, 128], strides = [1, 1]} : vector<8x512xf32> to vector<8x128xf32>
    %207 = vector.extract_strided_slice %202 {offsets = [0, 256], sizes = [8, 128], strides = [1, 1]} : vector<8x512xf32> to vector<8x128xf32>
    %208 = vector.extract_strided_slice %202 {offsets = [0, 384], sizes = [8, 128], strides = [1, 1]} : vector<8x512xf32> to vector<8x128xf32>
    %209 = arith.mulf %206, %181 : vector<8x128xf32>
    %210 = arith.mulf %205, %204 : vector<8x128xf32>
    %211 = arith.addf %209, %210 : vector<8x128xf32>
    %212 = math.tanh %211 : vector<8x128xf32>
    %213 = arith.mulf %207, %212 : vector<8x128xf32>
    %214 = arith.mulf %208, %212 : vector<8x128xf32>
    %215 = tpu.concatenate %214, %213, %211 in 1 : vector<8x128xf32>, vector<8x128xf32>, vector<8x128xf32> -> vector<8x384xf32>
    %216 = arith.index_cast %c6_i32 : i32 to index
    %c0_52 = arith.constant 0 : index
    %c0_53 = arith.constant 0 : index
    %217 = vector.load %arg7[%216, %c0_52, %c0_53] : memref<8x8x384xf32, #tpu.memory_space<vmem>>, vector<1x8x384xf32>
    %218 = vector.shape_cast %217 : vector<1x8x384xf32> to vector<8x384xf32>
    %219 = vector.shape_cast %215 : vector<8x384xf32> to vector<1x8x384xf32>
    tpu.vector_store %arg7[%216, %c0_52, %c0_53], %219 {strides = array<i32>} : memref<8x8x384xf32, #tpu.memory_space<vmem>>, vector<1x8x384xf32>,
    %220 = arith.truncf %213 : vector<8x128xf32> to vector<8x128xbf16>
    %c7_i32 = arith.constant 7 : i32
    %c8_i32_54 = arith.constant 8 : i32
    %221 = arith.muli %c7_i32, %c8_i32_54 : i32
    %222 = tpu.assume_multiple %221, 8 : i32
    %223 = arith.index_cast %222 : i32 to index
    %c0_55 = arith.constant 0 : index
    %224 = vector.load %arg8[%223, %c0_55] : memref<64x640xf32, #tpu.memory_space<vmem>>, vector<8x640xf32>
    %cst_56 = arith.constant dense<0.000000e+00> : vector<8x640xf32>
    %225 = tpu.matmul %220, %7, %cst_56 {dimension_numbers = #tpu.dot_dimension_numbers<[1], [0], [0], [1], [0, 0, 1, 1], [], []>} : vector<8x128xbf16>, vector<128x640xbf16>, vector<8x640xf32> -> vector<8x640xf32>
    %226 = arith.addf %224, %225 : vector<8x640xf32>
    %227 = vector.extract_strided_slice %226 {offsets = [0, 0], sizes = [8, 512], strides = [1, 1]} : vector<8x640xf32> to vector<8x512xf32>
    %228 = arith.negf %227 : vector<8x512xf32>
    %229 = math.exp %228 : vector<8x512xf32>
    %cst_57 = arith.constant 1.000000e+00 : f32
    %230 = vector.broadcast %cst_57 : f32 to vector<8x512xf32>
    %231 = arith.addf %230, %229 : vector<8x512xf32>
    %232 = arith.divf %230, %231 : vector<8x512xf32>
    %233 = vector.extract_strided_slice %226 {offsets = [0, 512], sizes = [8, 128], strides = [1, 1]} : vector<8x640xf32> to vector<8x128xf32>
    %234 = math.tanh %233 : vector<8x128xf32>
    %235 = vector.extract_strided_slice %232 {offsets = [0, 0], sizes = [8, 128], strides = [1, 1]} : vector<8x512xf32> to vector<8x128xf32>
    %236 = vector.extract_strided_slice %232 {offsets = [0, 128], sizes = [8, 128], strides = [1, 1]} : vector<8x512xf32> to vector<8x128xf32>
    %237 = vector.extract_strided_slice %232 {offsets = [0, 256], sizes = [8, 128], strides = [1, 1]} : vector<8x512xf32> to vector<8x128xf32>
    %238 = vector.extract_strided_slice %232 {offsets = [0, 384], sizes = [8, 128], strides = [1, 1]} : vector<8x512xf32> to vector<8x128xf32>
    %239 = arith.mulf %236, %211 : vector<8x128xf32>
    %240 = arith.mulf %235, %234 : vector<8x128xf32>
    %241 = arith.addf %239, %240 : vector<8x128xf32>
    %242 = math.tanh %241 : vector<8x128xf32>
    %243 = arith.mulf %237, %242 : vector<8x128xf32>
    %244 = arith.mulf %238, %242 : vector<8x128xf32>
    %245 = tpu.concatenate %244, %243, %241 in 1 : vector<8x128xf32>, vector<8x128xf32>, vector<8x128xf32> -> vector<8x384xf32>
    %246 = arith.index_cast %c7_i32 : i32 to index
    %c0_58 = arith.constant 0 : index
    %c0_59 = arith.constant 0 : index
    %247 = vector.load %arg7[%246, %c0_58, %c0_59] : memref<8x8x384xf32, #tpu.memory_space<vmem>>, vector<1x8x384xf32>
    %248 = vector.shape_cast %247 : vector<1x8x384xf32> to vector<8x384xf32>
    %249 = vector.shape_cast %245 : vector<8x384xf32> to vector<1x8x384xf32>
    tpu.vector_store %arg7[%246, %c0_58, %c0_59], %249 {strides = array<i32>} : memref<8x8x384xf32, #tpu.memory_space<vmem>>, vector<1x8x384xf32>,
    %250 = arith.truncf %243 : vector<8x128xf32> to vector<8x128xbf16>
    %c8_i32_60 = arith.constant 8 : i32
    return
  }
  func.func @transform_0(%arg0: i32) -> (i32, i32) {
    %c0_i32 = arith.constant 0 : i32
    %c0_i32_0 = arith.constant 0 : i32
    %c0_i32_1 = arith.constant 0 : i32
    return %c0_i32, %c0_i32_0 : i32, i32
  }
  func.func @transform_1(%arg0: i32) -> (i32, i32) {
    %c0_i32 = arith.constant 0 : i32
    %c0_i32_0 = arith.constant 0 : i32
    %c0_i32_1 = arith.constant 0 : i32
    return %c0_i32, %c0_i32_0 : i32, i32
  }
  func.func @transform_2(%arg0: i32) -> (i32, i32) {
    %c0_i32 = arith.constant 0 : i32
    %c0_i32_0 = arith.constant 0 : i32
    %c0_i32_1 = arith.constant 0 : i32
    return %c0_i32, %c0_i32_0 : i32, i32
  }
  func.func @transform_3(%arg0: i32) -> (i32, i32) {
    %c0_i32 = arith.constant 0 : i32
    %c0_i32_0 = arith.constant 0 : i32
    %c0_i32_1 = arith.constant 0 : i32
    return %c0_i32, %c0_i32_0 : i32, i32
  }
  func.func @transform_4(%arg0: i32) -> (i32, i32) {
    %c0_i32 = arith.constant 0 : i32
    %c0_i32_0 = arith.constant 0 : i32
    %c0_i32_1 = arith.constant 0 : i32
    return %c0_i32, %c0_i32_0 : i32, i32
  }
  func.func @transform_5(%arg0: i32) -> (i32, i32) {
    %c0_i32 = arith.constant 0 : i32
    %c0_i32_0 = arith.constant 0 : i32
    %c0_i32_1 = arith.constant 0 : i32
    return %c0_i32, %c0_i32_0 : i32, i32
  }
  func.func @transform_6(%arg0: i32) -> (i32, i32, i32) {
    %c0_i32 = arith.constant 0 : i32
    %c0_i32_0 = arith.constant 0 : i32
    %c0_i32_1 = arith.constant 0 : i32
    %c0_i32_2 = arith.constant 0 : i32
    return %c0_i32, %c0_i32_0, %c0_i32_1 : i32, i32, i32
  }
}

</mosaic_0001>

<bundles_post_ra>
// kernel: extended_lstm_seq.1
= control target key start
LH: loop header
LB: loop body
LE: loop exit
PB: predicated region body
PF: predicated region fallthrough
CT: control target
= control target key end

     0   :  { %11 = vsyncpa [#allocation4], 0  ;;  %s4391_s0 = inlined_call_operand.vmem [shape: bf16[64,256], index: 0, kind: input, shape index: {}]   ;;  %s4392_s1 = inlined_call_operand.vmem [shape: f32[8,128], index: 1, kind: input, shape index: {}]   ;;  %s4393_s2 = inlined_call_operand.vmem [shape: f32[8,128], index: 2, kind: input, shape index: {}]   ;;  %s4394_s3 = inlined_call_operand.hbm [shape: bf16[256,640], index: 3, kind: input, shape index: {}]   ;;  %s4395_s4 = inlined_call_operand.hbm [shape: bf16[128,640], index: 4, kind: input, shape index: {}]   ;;  %s4396_s5 = inlined_call_operand.vmem [shape: f32[1,640], index: 5, kind: input, shape index: {}]   ;;  %s4397_s6 = inlined_call_operand.vmem [shape: f32[8,8,384], index: 6, kind: output, shape index: {}]  }
   0x1   :  { %12 = vsyncpa [#allocation6], 0  ;;  %s3416_s21 = smov [#allocation3]   ;;  %s3368_s25 = scalar_lea.hbm %s4394_s3, 10240 }
   0x2   :  { %s24_s22 = sshll.u32 %s3416_s21, 4  ;;  %p3369_p0 = scmp.ne.s32.totalorder %s4394_s3, %s3368_s25  ;;  %s25_s22 = int_to_ptr.vmem [resolvable:$true] %s24_s22 }
   0x3   :  { %p3372_p1 = scmp.lt.u32.totalorder %s3368_s25, %s4394_s3 }
   0x5   :  { %p3374_p2 = pnand %p3372_p1, %p3369_p0 }
   0x7   :  { %3377 = shalt.err (!%p3374_p2)
}
   0x8   :  { %s3378_s30 = scalar_lea.vmem %s25_s22, 10240  ;;  %p3383_p4 = scmp.lt.s32.totalorder %s25_s22, %s25_s22 }
   0x9   :  { %p3379_p3 = scmp.ne.s32.totalorder %s25_s22, %s3378_s30  ;;  %p3384_p5 = scmp.lt.s32.totalorder %s3378_s30, %s3378_s30 }
   0xb   :  { %p3385_p6 = por %p3384_p5, %p3383_p4 }
   0xd   :  { %p3386_p7 = pnand %p3385_p6, %p3379_p3 }
   0xf   :  { %3389 = shalt.err (!%p3386_p7)
}
  0x10   :  { %s3417_s7 = smov 320   ;;  %s3418_s8 = smov 20  }
  0x11   :  { %30 = dma.hbm_to_vmem [thread:$0]  %s4394_s3, 10240, %s25_s22, [#allocation4], %s3417_s7, %s3417_s7, %s3418_s8  }
  0x12   :  { %s3419_s11 = smov [#allocation5]   ;;  %s3390_s15 = scalar_lea.hbm %s4395_s4, 5120 }
  0x13   :  { %s36_s12 = sshll.u32 %s3419_s11, 4  ;;  %p3391_p8 = scmp.ne.s32.totalorder %s4395_s4, %s3390_s15  ;;  %s37_s12 = int_to_ptr.vmem [resolvable:$true] %s36_s12 }
  0x14   :  { %p3394_p9 = scmp.lt.u32.totalorder %s3390_s15, %s4395_s4 }
  0x16   :  { %p3396_p10 = pnand %p3394_p9, %p3391_p8 }
  0x18   :  { %3399 = shalt.err (!%p3396_p10)
}
  0x19   :  { %s3400_s20 = scalar_lea.vmem %s37_s12, 5120  ;;  %p3405_p12 = scmp.lt.s32.totalorder %s37_s12, %s37_s12 }
  0x1a   :  { %p3401_p11 = scmp.ne.s32.totalorder %s37_s12, %s3400_s20  ;;  %p3406_p13 = scmp.lt.s32.totalorder %s3400_s20, %s3400_s20 }
  0x1c   :  { %p3407_p0 = por %p3406_p13, %p3405_p12 }
  0x1e   :  { %p3408_p1 = pnand %p3407_p0, %p3401_p11 }
  0x20   :  { %3411 = shalt.err (!%p3408_p1)
}
  0x21   :  { %42 = dma.hbm_to_vmem [thread:$0]  %s4395_s4, 5120, %s37_s12, [#allocation6], %s3417_s7, %s3417_s7, %s3418_s8  }
  0x22   :  { %3412 = dma.done.wait [#allocation4], 10240  }
  0x23   :  { %3413 = vsyncadd [#allocation4], 4294957056 }
  0x24   :  { %3414 = dma.done.wait [#allocation6], 5120  }
  0x25   :  { %3415 = vsyncadd [#allocation6], 4294962176  ;;  %v2988_v0 = vld [vmem:[#allocation3 + $0x4] ss:$20 sps:$4 sm:$0xff]   ;;  %v2990_v1 = vld [vmem:[#allocation3 + $0xc] ss:$20 sps:$4 sm:$0xff]  }
  0x26   :  { %639 = vmatprep.subr.bf16.mxu0 %v2988_v0  ;;  %v2992_v2 = vld [vmem:[#allocation3] ss:$20 sps:$4 sm:$0xff]   ;;  %v2993_v3 = vld [vmem:[#allocation3 + $0x8] ss:$20 sps:$4 sm:$0xff]   ;;  %712 = vmatprep.subr.bf16.mxu1 %v2990_v1  ;;  %v2999_v7 = vld [vmem:[#allocation3 + $0x30] ss:$20 sps:$4 sm:$0xff]  }
  0x27   :  { %v2994_v4 = vld [vmem:[#allocation3 + $0x2c] ss:$20 sps:$4 sm:$0xff]   ;;  %640 = vmatpush1.bf16.msra.mxu0 %v2992_v2  ;;  %713 = vmatpush1.bf16.msra.mxu1 %v2993_v3  ;;  %v2996_v5 = vld [vmem:[#allocation3 + $0x34] ss:$20 sps:$4 sm:$0xff]   ;;  %v3002_v9 = vld [vmem:[#allocation3 + $0x5c] ss:$20 sps:$4 sm:$0xff]  }
  0x28   :  { %v2998_v6 = vld [vmem:[#allocation3 + $0x28] ss:$20 sps:$4 sm:$0xff]   ;;  %641 = vmatprep.subr.bf16.mxu0 %v2994_v4  ;;  %714 = vmatprep.subr.bf16.mxu1 %v2996_v5  ;;  %v3004_v10 = vld [vmem:[#allocation3 + $0x50] ss:$20 sps:$4 sm:$0xff]   ;;  %v3005_v11 = vld [vmem:[#allocation3 + $0x58] ss:$20 sps:$4 sm:$0xff]  }
  0x29   :  { %v3000_v8 = vld [vmem:[#allocation3 + $0x54] ss:$20 sps:$4 sm:$0xff]   ;;  %v3006_v12 = vld [vmem:[#allocation3 + $0x7c] ss:$20 sps:$4 sm:$0xff]   ;;  %v3008_v13 = vld [vmem:[#allocation3 + $0x84] ss:$20 sps:$4 sm:$0xff]  }
  0x2a   :  { %v3010_v14 = vld [vmem:[#allocation3 + $0x78] ss:$20 sps:$4 sm:$0xff]   ;;  %v3011_v15 = vld [vmem:[#allocation3 + $0x80] ss:$20 sps:$4 sm:$0xff]   ;;  %v3017_v19 = vld [vmem:[#allocation3 + $0xa8] ss:$20 sps:$4 sm:$0xff]  }
  0x2b   :  { %642 = vmatpush1.bf16.msra.mxu0 %v2998_v6  ;;  %715 = vmatpush1.bf16.msra.mxu1 %v2999_v7  ;;  %v3012_v16 = vld [vmem:[#allocation3 + $0xa4] ss:$20 sps:$4 sm:$0xff]   ;;  %v3014_v17 = vld [vmem:[#allocation3 + $0xac] ss:$20 sps:$4 sm:$0xff]   ;;  %v3020_v21 = vld [vmem:[#allocation3 + $0xd4] ss:$20 sps:$4 sm:$0xff]  }
  0x2c   :  { %643 = vmatprep.subr.bf16.mxu0 %v3000_v8  ;;  %716 = vmatprep.subr.bf16.mxu1 %v3002_v9  ;;  %v3016_v18 = vld [vmem:[#allocation3 + $0xa0] ss:$20 sps:$4 sm:$0xff]   ;;  %v3022_v22 = vld [vmem:[#allocation3 + $0xc8] ss:$20 sps:$4 sm:$0xff]   ;;  %v3023_v23 = vld [vmem:[#allocation3 + $0xd0] ss:$20 sps:$4 sm:$0xff]  }
  0x2d   :  { %v3018_v20 = vld [vmem:[#allocation3 + $0xcc] ss:$20 sps:$4 sm:$0xff]   ;;  %v3024_v24 = vld [vmem:[#allocation3 + $0xf4] ss:$20 sps:$4 sm:$0xff]   ;;  %v3026_v25 = vld [vmem:[#allocation3 + $0xfc] ss:$20 sps:$4 sm:$0xff]  }
  0x2e   :  { %v3028_v26 = vld [vmem:[#allocation3 + $0xf0] ss:$20 sps:$4 sm:$0xff]   ;;  %v3029_v27 = vld [vmem:[#allocation3 + $0xf8] ss:$20 sps:$4 sm:$0xff]   ;;  %v3035_v31 = vld [vmem:[#allocation3 + $0x120] ss:$20 sps:$4 sm:$0xff]  }
  0x2f   :  { %644 = vmatpush1.bf16.msra.mxu0 %v3004_v10  ;;  %717 = vmatpush1.bf16.msra.mxu1 %v3005_v11  ;;  %v3030_v28 = vld [vmem:[#allocation3 + $0x11c] ss:$20 sps:$4 sm:$0xff]   ;;  %v3032_v29 = vld [vmem:[#allocation3 + $0x124] ss:$20 sps:$4 sm:$0xff]   ;;  %v3038_v33 = vld [vmem:[#allocation3 + $0x14c] ss:$20 sps:$4 sm:$0xff]  }
  0x30   :  { %645 = vmatprep.subr.bf16.mxu0 %v3006_v12  ;;  %718 = vmatprep.subr.bf16.mxu1 %v3008_v13  ;;  %v3034_v30 = vld [vmem:[#allocation3 + $0x118] ss:$20 sps:$4 sm:$0xff]   ;;  %v3040_v34 = vld [vmem:[#allocation3 + $0x140] ss:$20 sps:$4 sm:$0xff]   ;;  %v3041_v35 = vld [vmem:[#allocation3 + $0x148] ss:$20 sps:$4 sm:$0xff]  }
  0x31   :  { %v3036_v32 = vld [vmem:[#allocation3 + $0x144] ss:$20 sps:$4 sm:$0xff]   ;;  %v3042_v36 = vld [vmem:[#allocation3 + $0x16c] ss:$20 sps:$4 sm:$0xff]   ;;  %v3044_v37 = vld [vmem:[#allocation3 + $0x174] ss:$20 sps:$4 sm:$0xff]  }
  0x32   :  { %v3046_v38 = vld [vmem:[#allocation3 + $0x168] ss:$20 sps:$4 sm:$0xff]   ;;  %v3047_v39 = vld [vmem:[#allocation3 + $0x170] ss:$20 sps:$4 sm:$0xff]   ;;  %v3053_v43 = vld [vmem:[#allocation3 + $0x198] ss:$20 sps:$4 sm:$0xff]  }
  0x33   :  { %646 = vmatpush1.bf16.msra.mxu0 %v3010_v14  ;;  %719 = vmatpush1.bf16.msra.mxu1 %v3011_v15  ;;  %v3048_v40 = vld [vmem:[#allocation3 + $0x194] ss:$20 sps:$4 sm:$0xff]   ;;  %v3050_v41 = vld [vmem:[#allocation3 + $0x19c] ss:$20 sps:$4 sm:$0xff]   ;;  %v3056_v45 = vld [vmem:[#allocation3 + $0x1c4] ss:$20 sps:$4 sm:$0xff]  }
  0x34   :  { %647 = vmatprep.subr.bf16.mxu0 %v3012_v16  ;;  %720 = vmatprep.subr.bf16.mxu1 %v3014_v17  ;;  %v3052_v42 = vld [vmem:[#allocation3 + $0x190] ss:$20 sps:$4 sm:$0xff]   ;;  %v3058_v46 = vld [vmem:[#allocation3 + $0x1b8] ss:$20 sps:$4 sm:$0xff]   ;;  %v3059_v47 = vld [vmem:[#allocation3 + $0x1c0] ss:$20 sps:$4 sm:$0xff]  }
  0x35   :  { %v3054_v44 = vld [vmem:[#allocation3 + $0x1bc] ss:$20 sps:$4 sm:$0xff]   ;;  %v3485_v48 = vld [vmem:[%s4391_s0 + $0x4] ss:$8 sps:$4 sm:$0xff]   ;;  %v3064_v51 = vld [vmem:[#allocation3 + $0x1e0] ss:$20 sps:$4 sm:$0xff]  }
  0x36   :  { %v3060_v49 = vld [vmem:[#allocation3 + $0x1e4] ss:$20 sps:$4 sm:$0xff]   ;;  %v3062_v50 = vld [vmem:[#allocation3 + $0x1ec] ss:$20 sps:$4 sm:$0xff]   ;;  %671 = vmatprep.mubr.bf16.mxu0 %v3485_v48  ;;  %744 = vmatprep.mubr.bf16.mxu1 %v3485_v48  ;;  %v3065_v52 = vld [vmem:[#allocation3 + $0x1e8] ss:$20 sps:$4 sm:$0xff]  }
  0x37   :  { %648 = vmatpush1.bf16.msra.mxu0 %v3016_v18  ;;  %721 = vmatpush1.bf16.msra.mxu1 %v3017_v19  ;;  %v3066_v53 = vld [vmem:[#allocation3 + $0x20c] ss:$20 sps:$4 sm:$0xff]   ;;  %v3068_v54 = vld [vmem:[#allocation3 + $0x214] ss:$20 sps:$4 sm:$0xff]   ;;  %v3071_v56 = vld [vmem:[#allocation3 + $0x210] ss:$20 sps:$4 sm:$0xff]  }
  0x38   :  { %649 = vmatprep.subr.bf16.mxu0 %v3018_v20  ;;  %722 = vmatprep.subr.bf16.mxu1 %v3020_v21  ;;  %v3070_v55 = vld [vmem:[#allocation3 + $0x208] ss:$20 sps:$4 sm:$0xff]   ;;  %v3076_v59 = vld [vmem:[#allocation3 + $0x230] ss:$20 sps:$4 sm:$0xff]   ;;  %v3077_v60 = vld [vmem:[#allocation3 + $0x238] ss:$20 sps:$4 sm:$0xff]  }
  0x39   :  { %v3072_v57 = vld [vmem:[#allocation3 + $0x234] ss:$20 sps:$4 sm:$0xff]   ;;  %v3074_v58 = vld [vmem:[#allocation3 + $0x23c] ss:$20 sps:$4 sm:$0xff]   ;;  %v3080_v62 = vld [vmem:[#allocation3 + $0x264] ss:$20 sps:$4 sm:$0xff]  }
  0x3a   :  { %v3078_v61 = vld [vmem:[#allocation3 + $0x25c] ss:$20 sps:$4 sm:$0xff]   ;;  %v3082_v63 = vld [vmem:[#allocation3 + $0x258] ss:$20 sps:$4 sm:$0xff]   ;;  %v3083_v0 = vld [vmem:[#allocation3 + $0x260] ss:$20 sps:$4 sm:$0xff]  }
  0x3b   :  { %650 = vmatpush1.bf16.msra.mxu0 %v3022_v22  ;;  %723 = vmatpush1.bf16.msra.mxu1 %v3023_v23  ;;  %v3087_v1 = vld [vmem:[#allocation3 + $0x150] ss:$20 sps:$4 sm:$0xff]   ;;  %v3492_v2 = vld [vmem:[%s4391_s0] ss:$8 sps:$4 sm:$0xff]   ;;  %v3092_v6 = vld [vmem:[#allocation3 + $0x178] ss:$20 sps:$4 sm:$0xff]  }
  0x3c   :  { %651 = vmatprep.subr.bf16.mxu0 %v3024_v24  ;;  %724 = vmatprep.subr.bf16.mxu1 %v3026_v25  ;;  %v3494_v3 = vld [vmem:[#allocation5 + $0x4] ss:$20 sps:$4 sm:$0xff]   ;;  %v3496_v5 = vld [vmem:[#allocation5] ss:$20 sps:$4 sm:$0xff]   ;;  %v3508_v10 = vld [vmem:[#allocation5 + $0x28] ss:$20 sps:$4 sm:$0xff]  }
  0x3d   :  { %4409 = vst [vmem:[#allocation9_spill] sm:$0xff] %v3494_v3  ;;  %v3090_v4 = vld [vmem:[#allocation3 + $0x10] ss:$20 sps:$4 sm:$0xff]   ;;  %v3499_v7 = vld [vmem:[#allocation5 + $0x2c] ss:$20 sps:$4 sm:$0xff]   ;;  %vm3422_vm0 = vmmov 0  }
  0x3e   :  { %v3504_v8 = vld [vmem:[%s4391_s0 + $0x14] ss:$8 sps:$4 sm:$0xff]   ;;  %v3095_v9 = vld [vmem:[#allocation3 + $0x38] ss:$20 sps:$4 sm:$0xff]   ;;  %v3521_v15 = vld [vmem:[#allocation5 + $0x50] ss:$20 sps:$4 sm:$0xff]  }
  0x3f   :  { %652 = vmatpush1.bf16.msra.mxu0 %v3028_v26  ;;  %725 = vmatpush1.bf16.msra.mxu1 %v3029_v27  ;;  %v3100_v11 = vld [vmem:[#allocation3 + $0x1a0] ss:$20 sps:$4 sm:$0xff]   ;;  %v3515_v12 = vld [vmem:[%s4391_s0 + $0x10] ss:$8 sps:$4 sm:$0xff]   ;;  %v3105_v16 = vld [vmem:[#allocation3 + $0x1c8] ss:$20 sps:$4 sm:$0xff]  }
  0x40   :  { %653 = vmatprep.subr.bf16.mxu0 %v3030_v28  ;;  %726 = vmatprep.subr.bf16.mxu1 %v3032_v29  ;;  %v3517_v13 = vld [vmem:[#allocation5 + $0x54] ss:$20 sps:$4 sm:$0xff]   ;;  %v3525_v17 = vld [vmem:[#allocation5 + $0x7c] ss:$20 sps:$4 sm:$0xff]   ;;  %v3530_v19 = vld [vmem:[%s4391_s0 + $0x24] ss:$8 sps:$4 sm:$0xff]  }
  0x41   :  { %v3103_v14 = vld [vmem:[#allocation3 + $0x60] ss:$20 sps:$4 sm:$0xff]   ;;  %v3108_v18 = vld [vmem:[#allocation3 + $0x88] ss:$20 sps:$4 sm:$0xff]   ;;  %v3534_v20 = vld [vmem:[#allocation5 + $0x78] ss:$20 sps:$4 sm:$0xff]  }
  0x42   :  { %v3113_v21 = vld [vmem:[#allocation3 + $0x1f0] ss:$20 sps:$4 sm:$0xff]   ;;  %v3545_v23 = vld [vmem:[%s4391_s0 + $0x20] ss:$8 sps:$4 sm:$0xff]   ;;  %v3118_v26 = vld [vmem:[#allocation3 + $0x218] ss:$20 sps:$4 sm:$0xff]  }
  0x43   :  { %654 = vmatpush1.bf16.msra.mxu0 %v3034_v30  ;;  %727 = vmatpush1.bf16.msra.mxu1 %v3035_v31  ;;  %v3538_v22 = vld [vmem:[#allocation5 + $0xa4] ss:$20 sps:$4 sm:$0xff]   ;;  %v3548_v25 = vld [vmem:[#allocation5 + $0xa0] ss:$20 sps:$4 sm:$0xff]   ;;  %v3561_v30 = vld [vmem:[#allocation5 + $0xc8] ss:$20 sps:$4 sm:$0xff]  }
  0x44   :  { %655 = vmatprep.subr.bf16.mxu0 %v3036_v32  ;;  %728 = vmatprep.subr.bf16.mxu1 %v3038_v33  ;;  %v3116_v24 = vld [vmem:[#allocation3 + $0xb0] ss:$20 sps:$4 sm:$0xff]   ;;  %v3551_v27 = vld [vmem:[#allocation5 + $0xcc] ss:$20 sps:$4 sm:$0xff]   ;;  %v3556_v28 = vld [vmem:[%s4391_s0 + $0x34] ss:$8 sps:$4 sm:$0xff]  }
  0x45   :  { %v3121_v29 = vld [vmem:[#allocation3 + $0xd8] ss:$20 sps:$4 sm:$0xff]   ;;  %v3126_v31 = vld [vmem:[#allocation3 + $0x240] ss:$20 sps:$4 sm:$0xff]  }
  0x46   :  { %v3564_v32 = vld [vmem:[#allocation5 + $0xf4] ss:$20 sps:$4 sm:$0xff]   ;;  %v3571_v33 = vld [vmem:[%s4391_s0 + $0x30] ss:$8 sps:$4 sm:$0xff]  }
  0x47   :  { %656 = vmatpush1.bf16.msra.mxu0 %v3040_v34  ;;  %729 = vmatpush1.bf16.msra.mxu1 %v3041_v35  ;;  %v3129_v34 = vld [vmem:[#allocation3 + $0x100] ss:$20 sps:$4 sm:$0xff]   ;;  %v3573_v35 = vld [vmem:[#allocation5 + $0xf0] ss:$20 sps:$4 sm:$0xff]  }
  0x48   :  { %657 = vmatprep.subr.bf16.mxu0 %v3042_v36  ;;  %730 = vmatprep.subr.bf16.mxu1 %v3044_v37  ;;  %v3131_v36 = vld [vmem:[#allocation3 + $0x268] ss:$20 sps:$4 sm:$0xff]  }
  0x49   :  { %v3577_v37 = vld [vmem:[#allocation5 + $0x11c] ss:$20 sps:$4 sm:$0xff]  }
  0x4b   :  { %658 = vmatpush1.bf16.msra.mxu0 %v3046_v38  ;;  %731 = vmatpush1.bf16.msra.mxu1 %v3047_v39  ;;  %v3134_v38 = vld [vmem:[#allocation3 + $0x128] ss:$20 sps:$4 sm:$0xff]   ;;  %v3582_v39 = vld [vmem:[#allocation5 + $0x118] ss:$20 sps:$4 sm:$0xff]  }
  0x4c   :  { %659 = vmatprep.subr.bf16.mxu0 %v3048_v40  ;;  %732 = vmatprep.subr.bf16.mxu1 %v3050_v41  ;;  %v938_v40 = vld [vmem:[%s4392_s1] sm:$0xff] }
  0x4d   :  { %v3588_v41 = vld [vmem:[#allocation5 + $0xc] ss:$20 sps:$4 sm:$0xff]  }
  0x4f   :  { %660 = vmatpush1.bf16.msra.mxu0 %v3052_v42  ;;  %733 = vmatpush1.bf16.msra.mxu1 %v3053_v43  ;;  %v4398_v42 = vmov 0   ;;  %v3592_v43 = vpack.c.bf16 %v938_v40, %v938_v40 }
  0x50   :  { %661 = vmatprep.subr.bf16.mxu0 %v3054_v44  ;;  %734 = vmatprep.subr.bf16.mxu1 %v3056_v45  ;;  %v3595_v44 = vld [vmem:[#allocation5 + $0x8] ss:$20 sps:$4 sm:$0xff]   ;;  %v3597_v45 = vld [vmem:[#allocation5 + $0x10] ss:$20 sps:$4 sm:$0xff]  }
  0x53   :  { %662 = vmatpush1.bf16.msra.mxu0 %v3058_v46  ;;  %735 = vmatpush1.bf16.msra.mxu1 %v3059_v47  ;;  %v4400_v46 = vmov 0.0   ;;  %v3601_v47 = vld [vmem:[#allocation5 + $0x34] ss:$20 sps:$4 sm:$0xff]  }
  0x54   :  { %663 = vmatprep.subr.bf16.mxu0 %v3060_v49  ;;  %736 = vmatprep.subr.bf16.mxu1 %v3062_v50  ;;  %v3609_v49 = vld [vmem:[#allocation5 + $0x38] ss:$20 sps:$4 sm:$0xff]   ;;  %v3613_v50 = vld [vmem:[#allocation5 + $0x5c] ss:$20 sps:$4 sm:$0xff]  }
  0x57   :  { %664 = vmatpush1.bf16.msra.mxu0 %v3064_v51  ;;  %737 = vmatpush1.bf16.msra.mxu1 %v3065_v52  ;;  %v3620_v51 = vld [vmem:[#allocation5 + $0x58] ss:$20 sps:$4 sm:$0xff]   ;;  %v3622_v52 = vld [vmem:[#allocation5 + $0x60] ss:$20 sps:$4 sm:$0xff]  }
  0x58   :  { %665 = vmatprep.subr.bf16.mxu0 %v3066_v53  ;;  %738 = vmatprep.subr.bf16.mxu1 %v3068_v54  ;;  %v3626_v53 = vld [vmem:[#allocation5 + $0x84] ss:$20 sps:$4 sm:$0xff]   ;;  %v3631_v54 = vld [vmem:[#allocation5 + $0x80] ss:$20 sps:$4 sm:$0xff]  }
  0x5b   :  { %666 = vmatpush1.bf16.msra.mxu0 %v3070_v55  ;;  %739 = vmatpush1.bf16.msra.mxu1 %v3071_v56  ;;  %v3633_v55 = vld [vmem:[#allocation5 + $0x88] ss:$20 sps:$4 sm:$0xff]   ;;  %v3637_v56 = vld [vmem:[#allocation5 + $0xac] ss:$20 sps:$4 sm:$0xff]  }
  0x5c   :  { %667 = vmatprep.subr.bf16.mxu0 %v3072_v57  ;;  %740 = vmatprep.subr.bf16.mxu1 %v3074_v58  ;;  %v3642_v57 = vld [vmem:[#allocation5 + $0xa8] ss:$20 sps:$4 sm:$0xff]   ;;  %v3644_v58 = vld [vmem:[#allocation5 + $0xb0] ss:$20 sps:$4 sm:$0xff]  }
  0x5f   :  { %668 = vmatpush1.bf16.msra.mxu0 %v3076_v59  ;;  %741 = vmatpush1.bf16.msra.mxu1 %v3077_v60  ;;  %v3648_v59 = vld [vmem:[#allocation5 + $0xd4] ss:$20 sps:$4 sm:$0xff]   ;;  %v3653_v60 = vld [vmem:[#allocation5 + $0xd0] ss:$20 sps:$4 sm:$0xff]  }
  0x60   :  { %669 = vmatprep.subr.bf16.mxu0 %v3078_v61  ;;  %742 = vmatprep.subr.bf16.mxu1 %v3080_v62  ;;  %v3655_v61 = vld [vmem:[#allocation5 + $0xd8] ss:$20 sps:$4 sm:$0xff]   ;;  %v3659_v62 = vld [vmem:[#allocation5 + $0xfc] ss:$20 sps:$4 sm:$0xff]  }
  0x63   :  { %670 = vmatpush1.bf16.msra.mxu0 %v3082_v63  ;;  %743 = vmatpush1.bf16.msra.mxu1 %v3083_v0  ;;  %v3664_v63 = vld [vmem:[#allocation5 + $0xf8] ss:$20 sps:$4 sm:$0xff]   ;;  %v3666_v0 = vld [vmem:[#allocation5 + $0x100] ss:$20 sps:$4 sm:$0xff]  }
  0x64   :  { %2709 = vmatprep.subr.bf16.mxu0 %v3087_v1  ;;  %1157 = vmatprep.subr.bf16.mxu1 %v3494_v3  ;;  %4410 = vst [vmem:[#allocation10_spill] sm:$0xff] %v3664_v63  ;;  %v3670_v1 = vld [vmem:[#allocation5 + $0x124] ss:$20 sps:$4 sm:$0xff]  }
  0x65   :  { %4411 = vst [vmem:[#allocation11_spill] sm:$0xff] %v3670_v1 }
  0x66   :  { %672 = vmatmul.mubr.bf16.vlgmr.msra.gmra.mrb[0].mxu0 %v3492_v2  ;;  %745 = vmatmul.mubr.bf16.vlgmr.msra.gmra.mrb[0].mxu1 %v3492_v2 }
  0x67   :  { %2710 = vmatpush3.bf16.msra.mxu0 %v3090_v4  ;;  %1158 = vmatpush1.bf16.msra.mxu1 %v3496_v5  ;;  %v3677_v4 = vld [vmem:[#allocation5 + $0x128] ss:$20 sps:$4 sm:$0xff]  }
  0x68   :  { %2711 = vmatprep.subr.bf16.mxu0 %v3092_v6  ;;  %1159 = vmatprep.subr.bf16.mxu1 %v3499_v7  ;;  %v158_v6 = vlaneseq }
  0x69   :  { %681 = vmatprep.mubr.bf16.mxu0 %v3504_v8  ;;  %754 = vmatprep.mubr.bf16.mxu1 %v3504_v8 }
  0x6b   :  { %2712 = vmatpush3.bf16.msra.mxu0 %v3095_v9  ;;  %1160 = vmatpush1.bf16.msra.mxu1 %v3508_v10 }
  0x6c   :  { %2713 = vmatprep.subr.bf16.mxu0 %v3100_v11  ;;  %1161 = vmatprep.subr.bf16.mxu1 %v3517_v13  ;;  %v3728_v11 = vld [vmem:[%s4396_s5] sm:$0x1f] }
  0x6e   :  { %682 = vmatmul.mubr.bf16.gmra.mrb[4].mxu0 %v3515_v12  ;;  %755 = vmatmul.mubr.bf16.gmra.mrb[4].mxu1 %v3515_v12 }
  0x6f   :  { %2714 = vmatpush3.bf16.msra.mxu0 %v3103_v14  ;;  %1162 = vmatpush1.bf16.msra.mxu1 %v3521_v15 }
  0x70   :  { %2715 = vmatprep.subr.bf16.mxu0 %v3105_v16  ;;  %1163 = vmatprep.subr.bf16.mxu1 %v3525_v17 }
  0x71   :  { %691 = vmatprep.mubr.bf16.mxu0 %v3530_v19  ;;  %764 = vmatprep.mubr.bf16.mxu1 %v3530_v19 }
  0x73   :  { %2716 = vmatpush3.bf16.msra.mxu0 %v3108_v18  ;;  %1164 = vmatpush1.bf16.msra.mxu1 %v3534_v20 }
  0x74   :  { %2717 = vmatprep.subr.bf16.mxu0 %v3113_v21  ;;  %1165 = vmatprep.subr.bf16.mxu1 %v3538_v22 }
  0x76   :  { %692 = vmatmul.mubr.bf16.gmra.mrb[8].mxu0 %v3545_v23  ;;  %765 = vmatmul.mubr.bf16.gmra.mrb[8].mxu1 %v3545_v23 }
  0x77   :  { %2718 = vmatpush3.bf16.msra.mxu0 %v3116_v24  ;;  %1166 = vmatpush1.bf16.msra.mxu1 %v3548_v25 }
  0x78   :  { %2719 = vmatprep.subr.bf16.mxu0 %v3118_v26  ;;  %1167 = vmatprep.subr.bf16.mxu1 %v3551_v27 }
  0x79   :  { %701 = vmatprep.mubr.bf16.mxu0 %v3556_v28  ;;  %774 = vmatprep.mubr.bf16.mxu1 %v3556_v28 }
  0x7b   :  { %2720 = vmatpush3.bf16.msra.mxu0 %v3121_v29  ;;  %1168 = vmatpush1.bf16.msra.mxu1 %v3561_v30 }
  0x7c   :  { %2721 = vmatprep.subr.bf16.mxu0 %v3126_v31  ;;  %1169 = vmatprep.subr.bf16.mxu1 %v3564_v32 }
  0x7e   :  { %702 = vmatmul.mubr.bf16.gmra.mrb[12].mxu0 %v3571_v33  ;;  %775 = vmatmul.mubr.bf16.gmra.mrb[12].mxu1 %v3571_v33 }
  0x7f   :  { %2722 = vmatpush3.bf16.msra.mxu0 %v3129_v34  ;;  %1170 = vmatpush1.bf16.msra.mxu1 %v3573_v35 }
  0x80   :  { %2723 = vmatprep.subr.bf16.mxu0 %v3131_v36  ;;  %1171 = vmatprep.subr.bf16.mxu1 %v3577_v37 }
  0x81   :  { %817 = vmatprep.mubr.bf16.mxu0 %v3485_v48  ;;  %1189 = vmatprep.mubr.bf16.mxu1 %v4398_v42  ;;  %v3607_v48 = vld [vmem:[#allocation5 + $0x30] ss:$20 sps:$4 sm:$0xff]  }
  0x83   :  { %2724 = vmatpush3.bf16.msra.mxu0 %v3134_v38  ;;  %1172 = vmatpush1.bf16.msra.mxu1 %v3582_v39 }
  0x84   :  { %1198 = vmatprep.subr.bf16.mxu0 %v3588_v41  ;;  %2821 = vmatprep.subr.bf16.mxu1 %v4400_v46 }
  0x86   :  { %818 = vmatmul.mubr.bf16.vlgmr.msra.gmra.mrb[16].mxu0 %v3492_v2  ;;  %1190 = vmatmul.mubr.bf16.vlgmr.msra.gmra.mrb[16].mxu1 %v3592_v43  ;;  %v3675_v2 = vld [vmem:[#allocation5 + $0x120] ss:$20 sps:$4 sm:$0xff]  }
  0x87   :  { %1199 = vmatpush1.bf16.msra.mxu0 %v3595_v44  ;;  %2822 = vmatpush3.bf16.msra.mxu1 %v3597_v45  ;;  %4412 = vst [vmem:[#allocation12_spill] sm:$0xff] %v3675_v2 }
  0x88   :  { %1200 = vmatprep.subr.bf16.mxu0 %v3601_v47  ;;  %2823 = vmatprep.subr.bf16.mxu1 %v4400_v46 }
  0x89   :  { %825 = vmatprep.mubr.bf16.mxu0 %v3504_v8  ;;  %2837 = vmatprep.mubr.msk.bf16.mxu1 %vm3422_vm0, %v4400_v46  ;;  %v3722_v8 = vshrl.u32 %v158_v6, 7 }
  0x8b   :  { %1201 = vmatpush1.bf16.msra.mxu0 %v3607_v48  ;;  %2824 = vmatpush3.bf16.msra.mxu1 %v3609_v49  ;;  %v168_v9 = vsub.s32 2, %v3722_v8  ;;  %v164_v14 = vsub.s32 1, %v3722_v8  ;;  %v172_v16 = vsub.s32 3, %v3722_v8 }
  0x8c   :  { %1202 = vmatprep.subr.bf16.mxu0 %v3613_v50  ;;  %2825 = vmatprep.subr.bf16.mxu1 %v4400_v46 }
  0x8d   :  { %v3734_v18 = vrot.slane %v3728_v11, %v168_v9  ;;  %v3745_v29 = vrot.slane %v3728_v11, %v172_v16 }
  0x8e   :  { %826 = vmatmul.mubr.bf16.gmra.mrb[20].mxu0 %v3515_v12  ;;  %v160_v12 = vsub.s32 0, %v3722_v8 }
  0x8f   :  { %1203 = vmatpush1.bf16.msra.mxu0 %v3620_v51  ;;  %2826 = vmatpush3.bf16.msra.mxu1 %v3622_v52 }
  0x90   :  { %1204 = vmatprep.subr.bf16.mxu0 %v3626_v53  ;;  %2827 = vmatprep.subr.bf16.mxu1 %v4400_v46 }
  0x91   :  { %833 = vmatprep.mubr.bf16.mxu0 %v3530_v19 }
  0x93   :  { %1205 = vmatpush1.bf16.msra.mxu0 %v3631_v54  ;;  %2828 = vmatpush3.bf16.msra.mxu1 %v3633_v55 }
  0x94   :  { %1206 = vmatprep.subr.bf16.mxu0 %v3637_v56  ;;  %2829 = vmatprep.subr.bf16.mxu1 %v4400_v46 }
  0x96   :  { %834 = vmatmul.mubr.bf16.gmra.mrb[24].mxu0 %v3545_v23  ;;  %v161_v23 = vrot.slane %v3728_v11, %v160_v12 }
  0x97   :  { %1207 = vmatpush1.bf16.msra.mxu0 %v3642_v57  ;;  %2830 = vmatpush3.bf16.msra.mxu1 %v3644_v58 }
  0x98   :  { %1208 = vmatprep.subr.bf16.mxu0 %v3648_v59  ;;  %2831 = vmatprep.subr.bf16.mxu1 %v4400_v46 }
  0x99   :  { %841 = vmatprep.mubr.bf16.mxu0 %v3556_v28  ;;  %v165_v28 = vrot.slane %v3728_v11, %v164_v14 }
  0x9b   :  { %1209 = vmatpush1.bf16.msra.mxu0 %v3653_v60  ;;  %2832 = vmatpush3.bf16.msra.mxu1 %v3655_v61 }
  0x9c   :  { %1210 = vmatprep.subr.bf16.mxu0 %v3659_v62  ;;  %2833 = vmatprep.subr.bf16.mxu1 %v4400_v46 }
  0x9e   :  { %842 = vmatmul.mubr.bf16.gmra.mrb[28].mxu0 %v3571_v33 }
  0x9f   :  { %1211 = vmatpush1.bf16.msra.mxu0 %v3664_v63  ;;  %2834 = vmatpush3.bf16.msra.mxu1 %v3666_v0 }
  0xa0   :  { %1212 = vmatprep.subr.bf16.mxu0 %v3670_v1  ;;  %2835 = vmatprep.subr.bf16.mxu1 %v4400_v46 }
  0xa1   :  { %1230 = vmatprep.mubr.bf16.mxu0 %v4398_v42 }
  0xa3   :  { %1213 = vmatpush1.bf16.msra.mxu0 %v3675_v2  ;;  %2836 = vmatpush3.bf16.msra.mxu1 %v3677_v4 }
  0xa4   :  { %1327 = vmatprep.subr.bf16.mxu0 %v3494_v3  ;;  %1368 = vmatprep.subr.bf16.mxu1 %v3588_v41 }
  0xa6   :  { %1231 = vmatmul.mubr.bf16.vlgmr.msra.gmra.mrb[32].mxu0 %v3592_v43  ;;  %2838 = vmatmul.mubr.bf16.vlgmr.msra.gmra.mrb[20].mxu1 %v3592_v43 }
  0xa7   :  { %1328 = vmatpush1.bf16.msra.mxu0 %v3496_v5  ;;  %1369 = vmatpush1.bf16.msra.mxu1 %v3595_v44 }
  0xa8   :  { %1329 = vmatprep.subr.bf16.mxu0 %v3499_v7  ;;  %1370 = vmatprep.subr.bf16.mxu1 %v3601_v47 }
  0xa9   :  { %1359 = vmatprep.mubr.bf16.mxu0 %v4398_v42  ;;  %1400 = vmatprep.mubr.bf16.mxu1 %v4398_v42 }
  0xab   :  { %1330 = vmatpush1.bf16.msra.mxu0 %v3508_v10  ;;  %1371 = vmatpush1.bf16.msra.mxu1 %v3607_v48 }
  0xac   :  { %1331 = vmatprep.subr.bf16.mxu0 %v3517_v13  ;;  %1372 = vmatprep.subr.bf16.mxu1 %v3613_v50 }
  0xaf   :  { %1332 = vmatpush1.bf16.msra.mxu0 %v3521_v15  ;;  %1373 = vmatpush1.bf16.msra.mxu1 %v3620_v51 }
  0xb0   :  { %1333 = vmatprep.subr.bf16.mxu0 %v3525_v17  ;;  %1374 = vmatprep.subr.bf16.mxu1 %v3626_v53 }
  0xb3   :  { %1334 = vmatpush1.bf16.msra.mxu0 %v3534_v20  ;;  %1375 = vmatpush1.bf16.msra.mxu1 %v3631_v54 }
  0xb4   :  { %1335 = vmatprep.subr.bf16.mxu0 %v3538_v22  ;;  %1376 = vmatprep.subr.bf16.mxu1 %v3637_v56 }
  0xb7   :  { %1336 = vmatpush1.bf16.msra.mxu0 %v3548_v25  ;;  %1377 = vmatpush1.bf16.msra.mxu1 %v3642_v57 }
  0xb8   :  { %1337 = vmatprep.subr.bf16.mxu0 %v3551_v27  ;;  %1378 = vmatprep.subr.bf16.mxu1 %v3648_v59 }
  0xbb   :  { %1338 = vmatpush1.bf16.msra.mxu0 %v3561_v30  ;;  %1379 = vmatpush1.bf16.msra.mxu1 %v3653_v60 }
  0xbc   :  { %1339 = vmatprep.subr.bf16.mxu0 %v3564_v32  ;;  %1380 = vmatprep.subr.bf16.mxu1 %v3659_v62 }
  0xbf   :  { %1340 = vmatpush1.bf16.msra.mxu0 %v3573_v35  ;;  %1381 = vmatpush1.bf16.msra.mxu1 %v3664_v63 }
  0xc0   :  { %1341 = vmatprep.subr.bf16.mxu0 %v3577_v37  ;;  %1382 = vmatprep.subr.bf16.mxu1 %v3670_v1 }
  0xc3   :  { %1342 = vmatpush1.bf16.msra.mxu0 %v3582_v39  ;;  %1383 = vmatpush1.bf16.msra.mxu1 %v3675_v2 }
  0xc4   :  { %2841 = vmatprep.subr.bf16.mxu0 %v4400_v46  ;;  %1498 = vmatprep.subr.bf16.mxu1 %v3494_v3 }
 0x139   :  { %v3736_v19 = vpop.f32.mrb[0].mxu0  ;;  %v3738_v21 = vpop.f32.mrb[0].mxu1 }
 0x13a   :  { %v675_v24 = vpop.f32.mrb[1].mxu0  ;;  %v3741_v26 = vpop.f32.mrb[1].mxu1 }
 0x13b   :  { %v677_v31 = vpop.f32.mrb[2].mxu0  ;;  %v750_v33 = vpop.f32.mrb[2].mxu1 }
 0x13c   :  { %v3747_v34 = vadd.f32 %v677_v31, %v161_v23  ;;  %v3750_v36 = vadd.f32 %v750_v33, %v3734_v18  ;;  %v679_v38 = vpop.f32.mrb[3].mxu0  ;;  %v752_v40 = vpop.f32.mrb[3].mxu1 }
 0x13d   :  { %v3752_v43 = vadd.f32 %v679_v38, %v165_v28  ;;  %v3755_v6 = vadd.f32 %v752_v40, %v3745_v29 }
 0x13e   :  { %4413 = vst [vmem:[#allocation13_spill] sm:$0xff] %v3747_v34  ;;  %4414 = vst [vmem:[#allocation14_spill] sm:$0xff] %v3750_v36 }
 0x13f   :  { %4415 = vst [vmem:[#allocation15_spill] sm:$0xff] %v3752_v43  ;;  %4416 = vst [vmem:[#allocation16_spill] sm:$0xff] %v3755_v6 }
 0x141   :  { %v683_v9 = vpop.f32.mrb[4].mxu0  ;;  %v756_v12 = vpop.f32.mrb[4].mxu1 }
 0x142   :  { %v3757_v14 = vadd.f32 %v683_v9, %v161_v23  ;;  %v3760_v16 = vadd.f32 %v756_v12, %v3734_v18  ;;  %v685_v42 = vpop.f32.mrb[5].mxu0  ;;  %v758_v31 = vpop.f32.mrb[5].mxu1 }
 0x143   :  { %v3762_v46 = vadd.f32 %v685_v42, %v165_v28  ;;  %v3765_v33 = vadd.f32 %v758_v31, %v3745_v29  ;;  %v687_v36 = vpop.f32.mrb[6].mxu0  ;;  %v760_v38 = vpop.f32.mrb[6].mxu1 }
 0x144   :  { %4417 = vst [vmem:[#allocation17_spill] sm:$0xff] %v3757_v14  ;;  %4418 = vst [vmem:[#allocation18_spill] sm:$0xff] %v3760_v16  ;;  %v3767_v43 = vadd.f32 %v687_v36, %v161_v23  ;;  %v3770_v40 = vadd.f32 %v760_v38, %v3734_v18  ;;  %v689_v6 = vpop.f32.mrb[7].mxu0  ;;  %v762_v9 = vpop.f32.mrb[7].mxu1 }
 0x145   :  { %4419 = vst [vmem:[#allocation19_spill] sm:$0xff] %v3762_v46  ;;  %4420 = vst [vmem:[#allocation20_spill] sm:$0xff] %v3765_v33  ;;  %v3772_v14 = vadd.f32 %v689_v6, %v165_v28  ;;  %v3775_v12 = vadd.f32 %v762_v9, %v3745_v29 }
 0x146   :  { %4421 = vst [vmem:[#allocation21_spill] sm:$0xff] %v3767_v43  ;;  %4422 = vst [vmem:[#allocation22_spill] sm:$0xff] %v3770_v40 }
 0x147   :  { %4423 = vst [vmem:[#allocation23_spill] sm:$0xff] %v3772_v14  ;;  %4424 = vst [vmem:[#allocation24_spill] sm:$0xff] %v3775_v12 }
 0x149   :  { %v693_v16 = vpop.f32.mrb[8].mxu0  ;;  %v766_v42 = vpop.f32.mrb[8].mxu1 }
 0x14a   :  { %v3777_v46 = vadd.f32 %v693_v16, %v161_v23  ;;  %v3780_v31 = vadd.f32 %v766_v42, %v3734_v18  ;;  %v695_v33 = vpop.f32.mrb[9].mxu0  ;;  %v768_v36 = vpop.f32.mrb[9].mxu1 }
 0x14b   :  { %v3782_v43 = vadd.f32 %v695_v33, %v165_v28  ;;  %v3785_v38 = vadd.f32 %v768_v36, %v3745_v29  ;;  %v697_v40 = vpop.f32.mrb[10].mxu0  ;;  %v770_v6 = vpop.f32.mrb[10].mxu1 }
 0x14c   :  { %4425 = vst [vmem:[#allocation25_spill] sm:$0xff] %v3777_v46  ;;  %4426 = vst [vmem:[#allocation26_spill] sm:$0xff] %v3780_v31  ;;  %v3787_v14 = vadd.f32 %v697_v40, %v161_v23  ;;  %v3790_v9 = vadd.f32 %v770_v6, %v3734_v18  ;;  %v699_v12 = vpop.f32.mrb[11].mxu0  ;;  %v772_v16 = vpop.f32.mrb[11].mxu1 }
 0x14d   :  { %4427 = vst [vmem:[#allocation27_spill] sm:$0xff] %v3782_v43  ;;  %4428 = vst [vmem:[#allocation28_spill] sm:$0xff] %v3785_v38  ;;  %v3792_v46 = vadd.f32 %v699_v12, %v165_v28  ;;  %v3795_v42 = vadd.f32 %v772_v16, %v3745_v29 }
 0x14e   :  { %4429 = vst [vmem:[#allocation29_spill] sm:$0xff] %v3787_v14  ;;  %4430 = vst [vmem:[#allocation30_spill] sm:$0xff] %v3790_v9 }
 0x14f   :  { %4431 = vst [vmem:[#allocation31_spill] sm:$0xff] %v3792_v46  ;;  %4432 = vst [vmem:[#allocation32_spill] sm:$0xff] %v3795_v42 }
 0x151   :  { %v703_v31 = vpop.f32.mrb[12].mxu0  ;;  %v776_v33 = vpop.f32.mrb[12].mxu1 }
 0x152   :  { %v3797_v43 = vadd.f32 %v703_v31, %v161_v23  ;;  %v3800_v36 = vadd.f32 %v776_v33, %v3734_v18  ;;  %v705_v38 = vpop.f32.mrb[13].mxu0  ;;  %v778_v40 = vpop.f32.mrb[13].mxu1 }
 0x153   :  { %v3802_v14 = vadd.f32 %v705_v38, %v165_v28  ;;  %v3805_v6 = vadd.f32 %v778_v40, %v3745_v29  ;;  %v707_v9 = vpop.f32.mrb[14].mxu0  ;;  %v780_v12 = vpop.f32.mrb[14].mxu1  ;;  %v674_v38 = vadd.f32 %v3736_v19, %v161_v23 }
 0x154   :  { %4433 = vst [vmem:[#allocation33_spill] sm:$0xff] %v3797_v43  ;;  %4434 = vst [vmem:[#allocation34_spill] sm:$0xff] %v3800_v36  ;;  %v3807_v46 = vadd.f32 %v707_v9, %v161_v23  ;;  %v3810_v16 = vadd.f32 %v780_v12, %v3734_v18  ;;  %v709_v42 = vpop.f32.mrb[15].mxu0  ;;  %v782_v31 = vpop.f32.mrb[15].mxu1 }
 0x155   :  { %4435 = vst [vmem:[#allocation35_spill] sm:$0xff] %v3802_v14  ;;  %4436 = vst [vmem:[#allocation36_spill] sm:$0xff] %v3805_v6  ;;  %v3812_v43 = vadd.f32 %v709_v42, %v165_v28  ;;  %v3815_v33 = vadd.f32 %v782_v31, %v3745_v29  ;;  %v676_v14 = vadd.f32 %v675_v24, %v165_v28  ;;  %v176_v6 = vsub.s32 4, %v3722_v8 }
 0x156   :  { %4437 = vst [vmem:[#allocation37_spill] sm:$0xff] %v3807_v46  ;;  %4438 = vst [vmem:[#allocation38_spill] sm:$0xff] %v3810_v16 }
 0x157   :  { %4439 = vst [vmem:[#allocation39_spill] sm:$0xff] %v3812_v43  ;;  %4440 = vst [vmem:[#allocation40_spill] sm:$0xff] %v3815_v33  ;;  %v177_v31 = vrot.slane %v3728_v11, %v176_v6 }
 0x159   :  { %v2725_v36 = vpop.f32.mrb[16].mxu0  ;;  %v1191_v40 = vpop.f32.mrb[16].mxu1 }
 0x15a   :  { %v1279_v34 = vadd.f32 %v1191_v40, %v674_v38  ;;  %v2726_v9 = vpop.f32.mrb[17].mxu0  ;;  %v1193_v46 = vpop.f32.mrb[17].mxu1 }
 0x15b   :  { %v2727_v3 = vadd.f32 %v2726_v9, %v2725_v36  ;;  %v1280_v12 = vadd.f32 %v1193_v46, %v676_v14  ;;  %v2728_v16 = vpop.f32.mrb[18].mxu0  ;;  %v1195_v2 = vpop.f32.mrb[18].mxu1 }
 0x15c   :  { %v2729_v1 = vpop.f32.mrb[19].mxu0  ;;  %v1196_v42 = vpop.f32.mrb[19].mxu1  ;;  %v2656_v36 = vmul.f32 -1.442695, %v1279_v34 }
 0x15d   :  { %v2730_v43 = vadd.f32 %v2729_v1, %v2728_v16  ;;  %v2657_v8 = vmul.f32 -1.442695, %v1280_v12 }
 0x15f   :  { %v3820_v33 = vadd.f32 %v2730_v43, %v177_v31  ;;  %3168 = vpow2.f32 %v2657_v8 }
 0x160   :  { %3170 = vpow2.f32 %v2656_v36 }
 0x161   :  { %v2731_v19 = vpop.f32.mrb[20].mxu0 }
 0x162   :  { %v2732_v23 = vpop.f32.mrb[21].mxu0 }
 0x163   :  { %v2733_v24 = vadd.f32 %v2732_v23, %v2731_v19  ;;  %v2734_v28 = vpop.f32.mrb[22].mxu0 }
 0x164   :  { %v2735_v63 = vpop.f32.mrb[23].mxu0 }
 0x165   :  { %v2736_v38 = vadd.f32 %v2735_v63, %v2734_v28  ;;  %v3822_v40 = vadd.f32 %v2733_v24, %v177_v31 }
 0x167   :  { %v3824_v46 = vadd.f32 %v2736_v38, %v177_v31 }
 0x169   :  { %v2737_v2 = vpop.f32.mrb[24].mxu0  ;;  %v3169_v63 = vpop.eup %3168 }
 0x16a   :  { %v2738_v1 = vpop.f32.mrb[25].mxu0  ;;  %v3171_v34 = vpop.eup %3170  ;;  %v1297_v38 = vadd.f32 1.0, %v3169_v63 }
 0x16b   :  { %v2739_v14 = vadd.f32 %v2738_v1, %v2737_v2  ;;  %v2740_v11 = vpop.f32.mrb[26].mxu0  ;;  %v1296_v36 = vadd.f32 1.0, %v3171_v34  ;;  %v747_v1 = vadd.f32 %v3738_v21, %v3734_v18  ;;  %v940_v21 = vld [vmem:[%s4393_s2] sm:$0xff] }
 0x16c   :  { %v2741_v43 = vpop.f32.mrb[27].mxu0  ;;  %3172 = vrcp.f32 %v1297_v38 }
 0x16d   :  { %v2742_v6 = vadd.f32 %v2741_v43, %v2740_v11  ;;  %v3826_v16 = vadd.f32 %v2739_v14, %v177_v31  ;;  %v820_v14 = vadd.f32 %v2727_v3, %v177_v31  ;;  %v749_v11 = vadd.f32 %v3741_v26, %v3745_v29 }
 0x16e   :  { %3174 = vrcp.f32 %v1296_v36 }
 0x16f   :  { %4441 = vst [vmem:[#allocation41_spill] sm:$0xff] %v3826_v16  ;;  %v3828_v9 = vadd.f32 %v2742_v6, %v177_v31 }
 0x171   :  { %4442 = vst [vmem:[#allocation42_spill] sm:$0xff] %v3828_v9  ;;  %v2743_v42 = vpop.f32.mrb[28].mxu0 }
 0x172   :  { %v2744_v12 = vpop.f32.mrb[29].mxu0 }
 0x173   :  { %v2745_v19 = vadd.f32 %v2744_v12, %v2743_v42  ;;  %v2746_v23 = vpop.f32.mrb[30].mxu0 }
 0x174   :  { %v2747_v24 = vpop.f32.mrb[31].mxu0 }
 0x175   :  { %v2748_v28 = vadd.f32 %v2747_v24, %v2746_v23  ;;  %v3830_v8 = vadd.f32 %v2745_v19, %v177_v31 }
 0x176   :  { %v3173_v3 = vpop.eup %3172 }
 0x177   :  { %4443 = vst [vmem:[#allocation43_spill] sm:$0xff] %v3830_v8  ;;  %v3832_v2 = vadd.f32 %v2748_v28, %v177_v31  ;;  %v1309_v31 = vmul.f32 %v3173_v3, %v940_v21  ;;  %v4451_v3 = vld [vmem:[#allocation13_spill] sm:$0xff] }
 0x178   :  { %v3175_v26 = vpop.eup %3174 }
 0x179   :  { %4444 = vst [vmem:[#allocation44_spill] sm:$0xff] %v3832_v2  ;;  %v1232_v43 = vpop.f32.mrb[32].mxu0  ;;  %v1273_v6 = vpop.f32.mrb[20].mxu1 }
 0x17a   :  { %v1281_v42 = vadd.f32 %v1232_v43, %v747_v1  ;;  %v1283_v12 = vadd.f32 %v1273_v6, %v820_v14  ;;  %v1234_v9 = vpop.f32.mrb[33].mxu0  ;;  %v2839_v23 = vpop.f32.mrb[21].mxu1 }
 0x17b   :  { %v1282_v19 = vadd.f32 %v1234_v9, %v749_v11  ;;  %v1236_v63 = vpop.f32.mrb[34].mxu0  ;;  %v1276_v34 = vpop.f32.mrb[22].mxu1 }
 0x17c   :  { %v2658_v24 = vmul.f32 -1.442695, %v1281_v42  ;;  %3176 = vtanh.f32 %v1283_v12  ;;  %v1237_v28 = vpop.f32.mrb[35].mxu0  ;;  %v2840_v2 = vpop.f32.mrb[23].mxu1  ;;  %v4446_v63 = vmov 0   ;;  %v4449_v34 = vld [vmem:[#allocation12_spill] sm:$0xff] }
 0x17d   :  { %v2659_v18 = vmul.f32 -1.442695, %v1282_v19  ;;  %v4445_v19 = vmov 0.0  }
 0x17e   :  { %3178 = vpow2.f32 %v2658_v24  ;;  %v4450_v24 = vld [vmem:[#allocation9_spill] sm:$0xff] }
 0x17f   :  { %3180 = vpow2.f32 %v2659_v18 }
 0x186   :  { %v3177_v29 = vpop.eup %3176 }
 0x187   :  { %v1310_v38 = vmul.f32 %v3177_v29, %v3175_v26  ;;  %v4452_v26 = vld [vmem:[#allocation14_spill] sm:$0xff] }
 0x188   :  { %v3179_v36 = vpop.eup %3178 }
 0x189   :  { %v3181_v9 = vpop.eup %3180  ;;  %v1298_v1 = vadd.f32 1.0, %v3179_v36  ;;  %v3841_v14 = vadd.f32 %v1310_v38, %v1309_v31  ;;  %v4453_v36 = vld [vmem:[#allocation15_spill] sm:$0xff] }
 0x18a   :  { %v1299_v11 = vadd.f32 1.0, %v3181_v9 }
 0x18b   :  { %3182 = vrcp.f32 %v1298_v1  ;;  %1317 = vst [vmem:[%s4397_s6 + $0x10] sm:$0xff] %v3841_v14  ;;  %v4454_v1 = vld [vmem:[#allocation16_spill] sm:$0xff] }
 0x18c   :  { %3184 = vtanh.f32 %v3841_v14 }
 0x18d   :  { %3186 = vrcp.f32 %v1299_v11 }
 0x195   :  { %v3183_v2 = vpop.eup %3182 }
 0x196   :  { %v3185_v43 = vpop.eup %3184 }
 0x197   :  { %v3187_v6 = vpop.eup %3186  ;;  %v1313_v42 = vmul.f32 %v3185_v43, %v3183_v2 }
 0x198   :  { %v1314_v12 = vmul.f32 %v3187_v6, %v3185_v43 }
 0x199   :  { %1316 = vst [vmem:[%s4397_s6 + $0x8] sm:$0xff] %v1313_v42  ;;  %v1318_v23 = vpack.c.bf16 %v1313_v42, %v1313_v42 }
 0x19a   :  { %1315 = vst [vmem:[%s4397_s6] sm:$0xff] %v1314_v12 }
 0x19b   :  { %1360 = vmatmul.mubr.bf16.vlgmr.msra.gmra.mrb[36].mxu0 %v1318_v23  ;;  %1401 = vmatmul.mubr.bf16.vlgmr.msra.gmra.mrb[24].mxu1 %v1318_v23 }
 0x19c   :  { %2842 = vmatpush3.bf16.msra.mxu0 %v3597_v45  ;;  %2857 = vmatprep.mubr.msk.bf16.mxu0 %vm3422_vm0, %v4445_v19 }
 0x19d   :  { %2843 = vmatprep.subr.bf16.mxu0 %v4445_v19  ;;  %1499 = vmatpush1.bf16.msra.mxu1 %v3496_v5  ;;  %v4447_v5 = vld [vmem:[#allocation10_spill] sm:$0xff] }
 0x19e   :  { %1500 = vmatprep.subr.bf16.mxu1 %v3499_v7  ;;  %1530 = vmatprep.mubr.bf16.mxu1 %v4446_v63  ;;  %v4448_v7 = vld [vmem:[#allocation11_spill] sm:$0xff] }
 0x1a0   :  { %2844 = vmatpush3.bf16.msra.mxu0 %v3609_v49 }
 0x1a1   :  { %2845 = vmatprep.subr.bf16.mxu0 %v4445_v19  ;;  %1501 = vmatpush1.bf16.msra.mxu1 %v3508_v10 }
 0x1a2   :  { %1502 = vmatprep.subr.bf16.mxu1 %v3517_v13 }
 0x1a4   :  { %2846 = vmatpush3.bf16.msra.mxu0 %v3622_v52 }
 0x1a5   :  { %2847 = vmatprep.subr.bf16.mxu0 %v4445_v19  ;;  %1503 = vmatpush1.bf16.msra.mxu1 %v3521_v15 }
 0x1a6   :  { %1504 = vmatprep.subr.bf16.mxu1 %v3525_v17 }
 0x1a8   :  { %2848 = vmatpush3.bf16.msra.mxu0 %v3633_v55 }
 0x1a9   :  { %2849 = vmatprep.subr.bf16.mxu0 %v4445_v19  ;;  %1505 = vmatpush1.bf16.msra.mxu1 %v3534_v20 }
 0x1aa   :  { %1506 = vmatprep.subr.bf16.mxu1 %v3538_v22 }
 0x1ac   :  { %2850 = vmatpush3.bf16.msra.mxu0 %v3644_v58 }
 0x1ad   :  { %2851 = vmatprep.subr.bf16.mxu0 %v4445_v19  ;;  %1507 = vmatpush1.bf16.msra.mxu1 %v3548_v25 }
 0x1ae   :  { %1508 = vmatprep.subr.bf16.mxu1 %v3551_v27 }
 0x1b0   :  { %2852 = vmatpush3.bf16.msra.mxu0 %v3655_v61 }
 0x1b1   :  { %2853 = vmatprep.subr.bf16.mxu0 %v4445_v19  ;;  %1509 = vmatpush1.bf16.msra.mxu1 %v3561_v30 }
 0x1b2   :  { %1510 = vmatprep.subr.bf16.mxu1 %v3564_v32 }
 0x1b4   :  { %2854 = vmatpush3.bf16.msra.mxu0 %v3666_v0 }
 0x1b5   :  { %2855 = vmatprep.subr.bf16.mxu0 %v4445_v19  ;;  %1511 = vmatpush1.bf16.msra.mxu1 %v3573_v35 }
 0x1b6   :  { %1512 = vmatprep.subr.bf16.mxu1 %v3577_v37 }
 0x1b8   :  { %2856 = vmatpush3.bf16.msra.mxu0 %v3677_v4 }
 0x1b9   :  { %1539 = vmatprep.subr.bf16.mxu0 %v3588_v41  ;;  %1513 = vmatpush1.bf16.msra.mxu1 %v3582_v39 }
 0x1ba   :  { %2861 = vmatprep.subr.bf16.mxu1 %v4445_v19 }
 0x1bb   :  { %2858 = vmatmul.mubr.bf16.vlgmr.msra.gmra.mrb[40].mxu0 %v1318_v23 }
 0x1bc   :  { %1540 = vmatpush1.bf16.msra.mxu0 %v3595_v44  ;;  %1571 = vmatprep.mubr.bf16.mxu0 %v4446_v63 }
 0x1bd   :  { %1541 = vmatprep.subr.bf16.mxu0 %v3601_v47 }
 0x1c0   :  { %1542 = vmatpush1.bf16.msra.mxu0 %v3607_v48 }
 0x1c1   :  { %1543 = vmatprep.subr.bf16.mxu0 %v3613_v50 }
 0x1c4   :  { %1544 = vmatpush1.bf16.msra.mxu0 %v3620_v51 }
 0x1c5   :  { %1545 = vmatprep.subr.bf16.mxu0 %v3626_v53 }
 0x1c8   :  { %1546 = vmatpush1.bf16.msra.mxu0 %v3631_v54 }
 0x1c9   :  { %1547 = vmatprep.subr.bf16.mxu0 %v3637_v56 }
 0x1cc   :  { %1548 = vmatpush1.bf16.msra.mxu0 %v3642_v57 }
 0x1cd   :  { %1549 = vmatprep.subr.bf16.mxu0 %v3648_v59 }
 0x1d0   :  { %1550 = vmatpush1.bf16.msra.mxu0 %v3653_v60 }
 0x1d1   :  { %1551 = vmatprep.subr.bf16.mxu0 %v3659_v62 }
 0x1d4   :  { %1552 = vmatpush1.bf16.msra.mxu0 %v4447_v5 }
 0x1d5   :  { %1553 = vmatprep.subr.bf16.mxu0 %v4448_v7 }
 0x1d8   :  { %1554 = vmatpush1.bf16.msra.mxu0 %v4449_v34 }
 0x1d9   :  { %1669 = vmatprep.subr.bf16.mxu0 %v4450_v24 }
 0x26e   :  { %v1361_v28 = vpop.f32.mrb[36].mxu0  ;;  %v1402_v18 = vpop.f32.mrb[24].mxu1 }
 0x26f   :  { %v1449_v21 = vadd.f32 %v1361_v28, %v4451_v3  ;;  %v1451_v29 = vadd.f32 %v1402_v18, %v4452_v26  ;;  %v1363_v31 = vpop.f32.mrb[37].mxu0  ;;  %v1404_v38 = vpop.f32.mrb[25].mxu1 }
 0x270   :  { %v1450_v9 = vadd.f32 %v1363_v31, %v4453_v36  ;;  %v1452_v11 = vadd.f32 %v1404_v38, %v4454_v1  ;;  %v1365_v2 = vpop.f32.mrb[38].mxu0  ;;  %v1406_v43 = vpop.f32.mrb[26].mxu1 }
 0x271   :  { %v1366_v6 = vpop.f32.mrb[39].mxu0  ;;  %v1407_v42 = vpop.f32.mrb[27].mxu1  ;;  %v2660_v23 = vmul.f32 -1.442695, %v1449_v21  ;;  %v2662_v16 = vmul.f32 -1.442695, %v1451_v29 }
 0x272   :  { %v2661_v12 = vmul.f32 -1.442695, %v1450_v9  ;;  %v2663_v28 = vmul.f32 -1.442695, %v1452_v11 }
 0x274   :  { %3188 = vpow2.f32 %v2661_v12 }
 0x275   :  { %3190 = vpow2.f32 %v2660_v23 }
 0x276   :  { %3192 = vpow2.f32 %v2662_v16 }
 0x277   :  { %3194 = vpow2.f32 %v2663_v28 }
 0x27e   :  { %v3189_v24 = vpop.eup %3188 }
 0x27f   :  { %v3191_v8 = vpop.eup %3190  ;;  %v1467_v3 = vadd.f32 1.0, %v3189_v24 }
 0x280   :  { %v1466_v18 = vadd.f32 1.0, %v3191_v8  ;;  %v3193_v21 = vpop.eup %3192 }
 0x281   :  { %3196 = vrcp.f32 %v1467_v3  ;;  %v3195_v1 = vpop.eup %3194  ;;  %v1468_v6 = vadd.f32 1.0, %v3193_v21  ;;  %v3929_v3 = vld [vmem:[#allocation5] ss:$20 sps:$4 sm:$0xff]  }
 0x282   :  { %3198 = vrcp.f32 %v1466_v18  ;;  %v1469_v11 = vadd.f32 1.0, %v3195_v1  ;;  %v3932_v18 = vld [vmem:[#allocation5 + $0x2c] ss:$20 sps:$4 sm:$0xff]  }
 0x28b   :  { %v3197_v2 = vpop.eup %3196 }
 0x28c   :  { %v3199_v43 = vpop.eup %3198  ;;  %v1479_v8 = vmul.f32 %v3197_v2, %v3841_v14 }
 0x28e   :  { %v1443_v26 = vpop.f32.mrb[40].mxu0 }
 0x28f   :  { %v1453_v31 = vadd.f32 %v1443_v26, %v3820_v33  ;;  %v2859_v38 = vpop.f32.mrb[41].mxu0 }
 0x290   :  { %v1446_v36 = vpop.f32.mrb[42].mxu0 }
 0x291   :  { %3200 = vtanh.f32 %v1453_v31  ;;  %v2860_v9 = vpop.f32.mrb[43].mxu0 }
 0x292   :  { %3202 = vrcp.f32 %v1468_v6 }
 0x293   :  { %3204 = vrcp.f32 %v1469_v11 }
 0x29b   :  { %v3201_v29 = vpop.eup %3200 }
 0x29c   :  { %v1480_v16 = vmul.f32 %v3201_v29, %v3199_v43  ;;  %v3203_v33 = vpop.eup %3202 }
 0x29d   :  { %v3205_v12 = vpop.eup %3204 }
 0x29e   :  { %v3912_v42 = vadd.f32 %v1480_v16, %v1479_v8 }
 0x2a0   :  { %3206 = vtanh.f32 %v3912_v42  ;;  %2666 = vst [vmem:[%s4397_s6 + $0x28] sm:$0xff] %v3912_v42 }
 0x2aa   :  { %v3207_v23 = vpop.eup %3206 }
 0x2ab   :  { %v1484_v24 = vmul.f32 %v3207_v23, %v3205_v12  ;;  %v1483_v28 = vmul.f32 %v3207_v23, %v3203_v33 }
 0x2ad   :  { %2664 = vst [vmem:[%s4397_s6 + $0x18] sm:$0xff] %v1484_v24  ;;  %2665 = vst [vmem:[%s4397_s6 + $0x20] sm:$0xff] %v1483_v28  ;;  %v1489_v14 = vpack.c.bf16 %v1483_v28, %v1483_v28 }
 0x2af   :  { %1531 = vmatmul.mubr.bf16.vlgmr.msra.gmra.mrb[28].mxu1 %v1489_v14  ;;  %1572 = vmatmul.mubr.bf16.vlgmr.msra.gmra.mrb[44].mxu0 %v1489_v14 }
 0x2b0   :  { %2862 = vmatpush3.bf16.msra.mxu1 %v3597_v45  ;;  %2877 = vmatprep.mubr.msk.bf16.mxu1 %vm3422_vm0, %v4445_v19 }
 0x2b1   :  { %2863 = vmatprep.subr.bf16.mxu1 %v4445_v19  ;;  %1670 = vmatpush1.bf16.msra.mxu0 %v3929_v3 }
 0x2b2   :  { %1671 = vmatprep.subr.bf16.mxu0 %v3932_v18  ;;  %1701 = vmatprep.mubr.bf16.mxu0 %v4446_v63 }
 0x2b4   :  { %2864 = vmatpush3.bf16.msra.mxu1 %v3609_v49 }
 0x2b5   :  { %2865 = vmatprep.subr.bf16.mxu1 %v4445_v19  ;;  %1672 = vmatpush1.bf16.msra.mxu0 %v3508_v10  ;;  %v3980_v10 = vld [vmem:[#allocation5 + $0x4] ss:$20 sps:$4 sm:$0xff]  }
 0x2b6   :  { %1673 = vmatprep.subr.bf16.mxu0 %v3517_v13 }
 0x2b8   :  { %2866 = vmatpush3.bf16.msra.mxu1 %v3622_v52 }
 0x2b9   :  { %2867 = vmatprep.subr.bf16.mxu1 %v4445_v19  ;;  %1674 = vmatpush1.bf16.msra.mxu0 %v3521_v15 }
 0x2ba   :  { %1675 = vmatprep.subr.bf16.mxu0 %v3525_v17  ;;  %v4455_v17 = vld [vmem:[#allocation17_spill] sm:$0xff] }
 0x2bc   :  { %2868 = vmatpush3.bf16.msra.mxu1 %v3633_v55 }
 0x2bd   :  { %2869 = vmatprep.subr.bf16.mxu1 %v4445_v19  ;;  %1676 = vmatpush1.bf16.msra.mxu0 %v3534_v20 }
 0x2be   :  { %1677 = vmatprep.subr.bf16.mxu0 %v3538_v22  ;;  %v4456_v22 = vld [vmem:[#allocation18_spill] sm:$0xff] }
 0x2c0   :  { %2870 = vmatpush3.bf16.msra.mxu1 %v3644_v58 }
 0x2c1   :  { %2871 = vmatprep.subr.bf16.mxu1 %v4445_v19  ;;  %1678 = vmatpush1.bf16.msra.mxu0 %v3548_v25 }
 0x2c2   :  { %1679 = vmatprep.subr.bf16.mxu0 %v3551_v27 }
 0x2c4   :  { %2872 = vmatpush3.bf16.msra.mxu1 %v3655_v61 }
 0x2c5   :  { %2873 = vmatprep.subr.bf16.mxu1 %v4445_v19  ;;  %1680 = vmatpush1.bf16.msra.mxu0 %v3561_v30 }
 0x2c6   :  { %1681 = vmatprep.subr.bf16.mxu0 %v3564_v32  ;;  %v4457_v32 = vld [vmem:[#allocation19_spill] sm:$0xff] }
 0x2c8   :  { %2874 = vmatpush3.bf16.msra.mxu1 %v3666_v0 }
 0x2c9   :  { %2875 = vmatprep.subr.bf16.mxu1 %v4445_v19  ;;  %1682 = vmatpush1.bf16.msra.mxu0 %v3573_v35 }
 0x2ca   :  { %1683 = vmatprep.subr.bf16.mxu0 %v3577_v37  ;;  %v4458_v37 = vld [vmem:[#allocation20_spill] sm:$0xff] }
 0x2cc   :  { %2876 = vmatpush3.bf16.msra.mxu1 %v3677_v4 }
 0x2cd   :  { %1710 = vmatprep.subr.bf16.mxu1 %v3588_v41  ;;  %1684 = vmatpush1.bf16.msra.mxu0 %v3582_v39 }
 0x2ce   :  { %2881 = vmatprep.subr.bf16.mxu0 %v4445_v19 }
 0x2cf   :  { %2878 = vmatmul.mubr.bf16.vlgmr.msra.gmra.mrb[32].mxu1 %v1489_v14 }
 0x2d0   :  { %1711 = vmatpush1.bf16.msra.mxu1 %v3595_v44  ;;  %1742 = vmatprep.mubr.bf16.mxu1 %v4446_v63 }
 0x2d1   :  { %1712 = vmatprep.subr.bf16.mxu1 %v3601_v47 }
 0x2d4   :  { %1713 = vmatpush1.bf16.msra.mxu1 %v3607_v48 }
 0x2d5   :  { %1714 = vmatprep.subr.bf16.mxu1 %v3613_v50 }
 0x2d8   :  { %1715 = vmatpush1.bf16.msra.mxu1 %v3620_v51 }
 0x2d9   :  { %1716 = vmatprep.subr.bf16.mxu1 %v3626_v53 }
 0x2dc   :  { %1717 = vmatpush1.bf16.msra.mxu1 %v3631_v54 }
 0x2dd   :  { %1718 = vmatprep.subr.bf16.mxu1 %v3637_v56 }
 0x2e0   :  { %1719 = vmatpush1.bf16.msra.mxu1 %v3642_v57 }
 0x2e1   :  { %1720 = vmatprep.subr.bf16.mxu1 %v3648_v59 }
 0x2e4   :  { %1721 = vmatpush1.bf16.msra.mxu1 %v3653_v60 }
 0x2e5   :  { %1722 = vmatprep.subr.bf16.mxu1 %v3659_v62 }
 0x2e8   :  { %1723 = vmatpush1.bf16.msra.mxu1 %v4447_v5 }
 0x2e9   :  { %1724 = vmatprep.subr.bf16.mxu1 %v4448_v7 }
 0x2ec   :  { %1725 = vmatpush1.bf16.msra.mxu1 %v4449_v34 }
 0x2ed   :  { %1840 = vmatprep.subr.bf16.mxu1 %v3980_v10 }
 0x382   :  { %v1532_v13 = vpop.f32.mrb[28].mxu1  ;;  %v1573_v15 = vpop.f32.mrb[44].mxu0 }
 0x383   :  { %v1620_v20 = vadd.f32 %v1532_v13, %v4455_v17  ;;  %v1622_v25 = vadd.f32 %v1573_v15, %v4456_v22  ;;  %v1534_v27 = vpop.f32.mrb[29].mxu1  ;;  %v1575_v30 = vpop.f32.mrb[45].mxu0 }
 0x384   :  { %v1621_v35 = vadd.f32 %v1534_v27, %v4457_v32  ;;  %v1623_v39 = vadd.f32 %v1575_v30, %v4458_v37  ;;  %v1536_v41 = vpop.f32.mrb[30].mxu1  ;;  %v1577_v44 = vpop.f32.mrb[46].mxu0  ;;  %v4011_v30 = vld [vmem:[#allocation5 + $0x28] ss:$20 sps:$4 sm:$0xff]   ;;  %v4019_v32 = vld [vmem:[#allocation5 + $0x50] ss:$20 sps:$4 sm:$0xff]  }
 0x385   :  { %v1537_v47 = vpop.f32.mrb[31].mxu1  ;;  %v1578_v48 = vpop.f32.mrb[47].mxu0  ;;  %v2667_v31 = vmul.f32 -1.442695, %v1620_v20  ;;  %v2669_v9 = vmul.f32 -1.442695, %v1622_v25 }
 0x386   :  { %v2668_v26 = vmul.f32 -1.442695, %v1621_v35  ;;  %v2670_v21 = vmul.f32 -1.442695, %v1623_v39  ;;  %v4022_v35 = vld [vmem:[#allocation5 + $0x7c] ss:$20 sps:$4 sm:$0xff]  }
 0x387   :  { %v4030_v37 = vld [vmem:[#allocation5 + $0xa4] ss:$20 sps:$4 sm:$0xff]   ;;  %v4038_v39 = vld [vmem:[#allocation5 + $0xcc] ss:$20 sps:$4 sm:$0xff]   ;;  %v4046_v41 = vld [vmem:[#allocation5 + $0xf4] ss:$20 sps:$4 sm:$0xff]  }
 0x388   :  { %3208 = vpow2.f32 %v2668_v26  ;;  %v4054_v44 = vld [vmem:[#allocation5 + $0x11c] ss:$20 sps:$4 sm:$0xff]   ;;  %v4061_v47 = vld [vmem:[#allocation5 + $0x118] ss:$20 sps:$4 sm:$0xff]   ;;  %v4069_v48 = vld [vmem:[#allocation5 + $0x34] ss:$20 sps:$4 sm:$0xff]  }
 0x389   :  { %3210 = vpow2.f32 %v2667_v31  ;;  %v4461_v31 = vld [vmem:[#allocation23_spill] sm:$0xff] }
 0x38a   :  { %3212 = vpow2.f32 %v2669_v9 }
 0x38b   :  { %3214 = vpow2.f32 %v2670_v21 }
 0x392   :  { %v3209_v38 = vpop.eup %3208 }
 0x393   :  { %v3211_v36 = vpop.eup %3210  ;;  %v1638_v1 = vadd.f32 1.0, %v3209_v38  ;;  %v4462_v38 = vld [vmem:[#allocation24_spill] sm:$0xff] }
 0x394   :  { %v1637_v2 = vadd.f32 1.0, %v3211_v36  ;;  %v3213_v16 = vpop.eup %3212 }
 0x395   :  { %3216 = vrcp.f32 %v1638_v1  ;;  %v3215_v33 = vpop.eup %3214  ;;  %v1639_v24 = vadd.f32 1.0, %v3213_v16 }
 0x396   :  { %3218 = vrcp.f32 %v1637_v2  ;;  %v1640_v14 = vadd.f32 1.0, %v3215_v33 }
 0x39f   :  { %v3217_v12 = vpop.eup %3216 }
 0x3a0   :  { %v3219_v23 = vpop.eup %3218  ;;  %v1650_v13 = vmul.f32 %v3217_v12, %v3912_v42 }
 0x3a2   :  { %v1614_v43 = vpop.f32.mrb[32].mxu1 }
 0x3a3   :  { %v1624_v6 = vadd.f32 %v1614_v43, %v3822_v40  ;;  %v2879_v29 = vpop.f32.mrb[33].mxu1 }
 0x3a4   :  { %v1617_v11 = vpop.f32.mrb[34].mxu1 }
 0x3a5   :  { %3220 = vtanh.f32 %v1624_v6  ;;  %v2880_v8 = vpop.f32.mrb[35].mxu1 }
 0x3a6   :  { %3222 = vrcp.f32 %v1639_v24 }
 0x3a7   :  { %3224 = vrcp.f32 %v1640_v14 }
 0x3af   :  { %v3221_v28 = vpop.eup %3220 }
 0x3b0   :  { %v1651_v15 = vmul.f32 %v3221_v28, %v3219_v23  ;;  %v3223_v40 = vpop.eup %3222 }
 0x3b1   :  { %v3225_v20 = vpop.eup %3224 }
 0x3b2   :  { %v3989_v17 = vadd.f32 %v1651_v15, %v1650_v13 }
 0x3b4   :  { %3226 = vtanh.f32 %v3989_v17  ;;  %2673 = vst [vmem:[%s4397_s6 + $0x40] sm:$0xff] %v3989_v17 }
 0x3be   :  { %v3227_v22 = vpop.eup %3226 }
 0x3bf   :  { %v1655_v25 = vmul.f32 %v3227_v22, %v3225_v20  ;;  %v1654_v27 = vmul.f32 %v3227_v22, %v3223_v40 }
 0x3c1   :  { %2671 = vst [vmem:[%s4397_s6 + $0x30] sm:$0xff] %v1655_v25  ;;  %2672 = vst [vmem:[%s4397_s6 + $0x38] sm:$0xff] %v1654_v27  ;;  %v1660_v42 = vpack.c.bf16 %v1654_v27, %v1654_v27 }
 0x3c3   :  { %1702 = vmatmul.mubr.bf16.vlgmr.msra.gmra.mrb[48].mxu0 %v1660_v42  ;;  %1743 = vmatmul.mubr.bf16.vlgmr.msra.gmra.mrb[36].mxu1 %v1660_v42 }
 0x3c4   :  { %2882 = vmatpush3.bf16.msra.mxu0 %v3597_v45  ;;  %2897 = vmatprep.mubr.msk.bf16.mxu0 %vm3422_vm0, %v4445_v19  ;;  %v4014_v45 = vld [vmem:[#allocation5 + $0x54] ss:$20 sps:$4 sm:$0xff]  }
 0x3c5   :  { %2883 = vmatprep.subr.bf16.mxu0 %v4445_v19  ;;  %1841 = vmatpush1.bf16.msra.mxu1 %v3929_v3 }
 0x3c6   :  { %1842 = vmatprep.subr.bf16.mxu1 %v3932_v18  ;;  %1872 = vmatprep.mubr.bf16.mxu1 %v4446_v63 }
 0x3c8   :  { %2884 = vmatpush3.bf16.msra.mxu0 %v3609_v49  ;;  %v4027_v49 = vld [vmem:[#allocation5 + $0x78] ss:$20 sps:$4 sm:$0xff]  }
 0x3c9   :  { %2885 = vmatprep.subr.bf16.mxu0 %v4445_v19  ;;  %1843 = vmatpush1.bf16.msra.mxu1 %v4011_v30 }
 0x3ca   :  { %1844 = vmatprep.subr.bf16.mxu1 %v4014_v45 }
 0x3cc   :  { %2886 = vmatpush3.bf16.msra.mxu0 %v3622_v52  ;;  %v4035_v52 = vld [vmem:[#allocation5 + $0xa0] ss:$20 sps:$4 sm:$0xff]  }
 0x3cd   :  { %2887 = vmatprep.subr.bf16.mxu0 %v4445_v19  ;;  %1845 = vmatpush1.bf16.msra.mxu1 %v4019_v32 }
 0x3ce   :  { %1846 = vmatprep.subr.bf16.mxu1 %v4022_v35 }
 0x3d0   :  { %2888 = vmatpush3.bf16.msra.mxu0 %v3633_v55  ;;  %v4043_v55 = vld [vmem:[#allocation5 + $0xc8] ss:$20 sps:$4 sm:$0xff]  }
 0x3d1   :  { %2889 = vmatprep.subr.bf16.mxu0 %v4445_v19  ;;  %1847 = vmatpush1.bf16.msra.mxu1 %v4027_v49 }
 0x3d2   :  { %1848 = vmatprep.subr.bf16.mxu1 %v4030_v37 }
 0x3d4   :  { %2890 = vmatpush3.bf16.msra.mxu0 %v3644_v58  ;;  %v4051_v58 = vld [vmem:[#allocation5 + $0xf0] ss:$20 sps:$4 sm:$0xff]  }
 0x3d5   :  { %2891 = vmatprep.subr.bf16.mxu0 %v4445_v19  ;;  %1849 = vmatpush1.bf16.msra.mxu1 %v4035_v52 }
 0x3d6   :  { %1850 = vmatprep.subr.bf16.mxu1 %v4038_v39 }
 0x3d8   :  { %2892 = vmatpush3.bf16.msra.mxu0 %v3655_v61  ;;  %v4058_v61 = vld [vmem:[#allocation5 + $0xc] ss:$20 sps:$4 sm:$0xff]  }
 0x3d9   :  { %2893 = vmatprep.subr.bf16.mxu0 %v4445_v19  ;;  %1851 = vmatpush1.bf16.msra.mxu1 %v4043_v55 }
 0x3da   :  { %1852 = vmatprep.subr.bf16.mxu1 %v4046_v41 }
 0x3dc   :  { %2894 = vmatpush3.bf16.msra.mxu0 %v3666_v0  ;;  %v4065_v0 = vld [vmem:[#allocation5 + $0x8] ss:$20 sps:$4 sm:$0xff]  }
 0x3dd   :  { %2895 = vmatprep.subr.bf16.mxu0 %v4445_v19  ;;  %1853 = vmatpush1.bf16.msra.mxu1 %v4051_v58 }
 0x3de   :  { %1854 = vmatprep.subr.bf16.mxu1 %v4054_v44 }
 0x3e0   :  { %2896 = vmatpush3.bf16.msra.mxu0 %v3677_v4  ;;  %v4072_v4 = vld [vmem:[#allocation5 + $0x30] ss:$20 sps:$4 sm:$0xff]  }
 0x3e1   :  { %1881 = vmatprep.subr.bf16.mxu0 %v4058_v61  ;;  %1855 = vmatpush1.bf16.msra.mxu1 %v4061_v47 }
 0x3e2   :  { %2901 = vmatprep.subr.bf16.mxu1 %v4445_v19 }
 0x3e3   :  { %2898 = vmatmul.mubr.bf16.vlgmr.msra.gmra.mrb[52].mxu0 %v1660_v42 }
 0x3e4   :  { %1882 = vmatpush1.bf16.msra.mxu0 %v4065_v0  ;;  %1913 = vmatprep.mubr.bf16.mxu0 %v4446_v63 }
 0x3e5   :  { %1883 = vmatprep.subr.bf16.mxu0 %v4069_v48 }
 0x3e8   :  { %1884 = vmatpush1.bf16.msra.mxu0 %v4072_v4 }
 0x3e9   :  { %1885 = vmatprep.subr.bf16.mxu0 %v3613_v50 }
 0x3ec   :  { %1886 = vmatpush1.bf16.msra.mxu0 %v3620_v51 }
 0x3ed   :  { %1887 = vmatprep.subr.bf16.mxu0 %v3626_v53  ;;  %v4459_v53 = vld [vmem:[#allocation21_spill] sm:$0xff] }
 0x3f0   :  { %1888 = vmatpush1.bf16.msra.mxu0 %v3631_v54 }
 0x3f1   :  { %1889 = vmatprep.subr.bf16.mxu0 %v3637_v56  ;;  %v4460_v56 = vld [vmem:[#allocation22_spill] sm:$0xff] }
 0x3f4   :  { %1890 = vmatpush1.bf16.msra.mxu0 %v3642_v57 }
 0x3f5   :  { %1891 = vmatprep.subr.bf16.mxu0 %v3648_v59 }
 0x3f8   :  { %1892 = vmatpush1.bf16.msra.mxu0 %v3653_v60 }
 0x3f9   :  { %1893 = vmatprep.subr.bf16.mxu0 %v3659_v62 }
 0x3fc   :  { %1894 = vmatpush1.bf16.msra.mxu0 %v4447_v5 }
 0x3fd   :  { %1895 = vmatprep.subr.bf16.mxu0 %v4448_v7 }
 0x400   :  { %1896 = vmatpush1.bf16.msra.mxu0 %v4449_v34 }
 0x401   :  { %2011 = vmatprep.subr.bf16.mxu0 %v3980_v10 }
 0x496   :  { %v1703_v50 = vpop.f32.mrb[48].mxu0  ;;  %v1744_v51 = vpop.f32.mrb[36].mxu1 }
 0x497   :  { %v1791_v54 = vadd.f32 %v1703_v50, %v4459_v53  ;;  %v1793_v57 = vadd.f32 %v1744_v51, %v4460_v56  ;;  %v1705_v26 = vpop.f32.mrb[49].mxu0  ;;  %v1746_v59 = vpop.f32.mrb[37].mxu1  ;;  %v4116_v56 = vld [vmem:[#allocation5 + $0x38] ss:$20 sps:$4 sm:$0xff]  }
 0x498   :  { %v1792_v60 = vadd.f32 %v1705_v26, %v4461_v31  ;;  %v1794_v62 = vadd.f32 %v1746_v59, %v4462_v38  ;;  %v1707_v36 = vpop.f32.mrb[50].mxu0  ;;  %v1748_v5 = vpop.f32.mrb[38].mxu1  ;;  %v4128_v26 = vld [vmem:[#allocation5 + $0x88] ss:$20 sps:$4 sm:$0xff]   ;;  %v4134_v59 = vld [vmem:[#allocation5 + $0xb0] ss:$20 sps:$4 sm:$0xff]  }
 0x499   :  { %v1708_v9 = vpop.f32.mrb[51].mxu0  ;;  %v1749_v7 = vpop.f32.mrb[39].mxu1  ;;  %v2674_v34 = vmul.f32 -1.442695, %v1791_v54  ;;  %v2676_v43 = vmul.f32 -1.442695, %v1793_v57 }
 0x49a   :  { %v2675_v21 = vmul.f32 -1.442695, %v1792_v60  ;;  %v2677_v6 = vmul.f32 -1.442695, %v1794_v62  ;;  %v4107_v54 = vld [vmem:[#allocation5 + $0x10] ss:$20 sps:$4 sm:$0xff]  }
 0x49b   :  { %v4122_v57 = vld [vmem:[#allocation5 + $0x60] ss:$20 sps:$4 sm:$0xff]   ;;  %v4140_v31 = vld [vmem:[#allocation5 + $0xd8] ss:$20 sps:$4 sm:$0xff]   ;;  %v4152_v38 = vld [vmem:[#allocation5 + $0x128] ss:$20 sps:$4 sm:$0xff]  }
 0x49c   :  { %3228 = vpow2.f32 %v2675_v21  ;;  %v4146_v60 = vld [vmem:[#allocation5 + $0x100] ss:$20 sps:$4 sm:$0xff]   ;;  %v4162_v62 = vld [vmem:[#allocation5 + $0x5c] ss:$20 sps:$4 sm:$0xff]   ;;  %v4165_v36 = vld [vmem:[#allocation5 + $0x58] ss:$20 sps:$4 sm:$0xff]  }
 0x49d   :  { %3230 = vpow2.f32 %v2674_v34  ;;  %v4168_v5 = vld [vmem:[#allocation5 + $0x84] ss:$20 sps:$4 sm:$0xff]   ;;  %v4171_v9 = vld [vmem:[#allocation5 + $0x80] ss:$20 sps:$4 sm:$0xff]   ;;  %v4177_v21 = vld [vmem:[#allocation5 + $0xa8] ss:$20 sps:$4 sm:$0xff]  }
 0x49e   :  { %3232 = vpow2.f32 %v2676_v43  ;;  %v4174_v7 = vld [vmem:[#allocation5 + $0xac] ss:$20 sps:$4 sm:$0xff]   ;;  %v4180_v34 = vld [vmem:[#allocation5 + $0xd4] ss:$20 sps:$4 sm:$0xff]  }
 0x49f   :  { %3234 = vpow2.f32 %v2677_v6  ;;  %v4189_v43 = vld [vmem:[#allocation5 + $0xf8] ss:$20 sps:$4 sm:$0xff]  }
 0x4a0   :  { %v4192_v6 = vld [vmem:[#allocation5 + $0x124] ss:$20 sps:$4 sm:$0xff]  }
 0x4a6   :  { %v3229_v1 = vpop.eup %3228 }
 0x4a7   :  { %v3231_v2 = vpop.eup %3230  ;;  %v1809_v29 = vadd.f32 1.0, %v3229_v1  ;;  %v4183_v1 = vld [vmem:[#allocation5 + $0xd0] ss:$20 sps:$4 sm:$0xff]  }
 0x4a8   :  { %v1808_v11 = vadd.f32 1.0, %v3231_v2  ;;  %v3233_v24 = vpop.eup %3232  ;;  %v4186_v2 = vld [vmem:[#allocation5 + $0xfc] ss:$20 sps:$4 sm:$0xff]  }
 0x4a9   :  { %3236 = vrcp.f32 %v1809_v29  ;;  %v3235_v28 = vpop.eup %3234  ;;  %v1810_v15 = vadd.f32 1.0, %v3233_v24  ;;  %v4195_v29 = vld [vmem:[#allocation5 + $0x120] ss:$20 sps:$4 sm:$0xff]  }
 0x4aa   :  { %3238 = vrcp.f32 %v1808_v11  ;;  %v1811_v20 = vadd.f32 1.0, %v3235_v28 }
 0x4b3   :  { %v3237_v14 = vpop.eup %3236 }
 0x4b4   :  { %v3239_v13 = vpop.eup %3238  ;;  %v1821_v22 = vmul.f32 %v3237_v14, %v3989_v17  ;;  %v4465_v14 = vld [vmem:[#allocation27_spill] sm:$0xff] }
 0x4b6   :  { %v1785_v8 = vpop.f32.mrb[52].mxu0 }
 0x4b7   :  { %v1795_v16 = vadd.f32 %v1785_v8, %v3824_v46  ;;  %v2899_v33 = vpop.f32.mrb[53].mxu0 }
 0x4b8   :  { %v1788_v12 = vpop.f32.mrb[54].mxu0 }
 0x4b9   :  { %3240 = vtanh.f32 %v1795_v16  ;;  %v2900_v23 = vpop.f32.mrb[55].mxu0  ;;  %v4463_v16 = vld [vmem:[#allocation25_spill] sm:$0xff]  ;;  %v4464_v12 = vld [vmem:[#allocation26_spill] sm:$0xff] }
 0x4ba   :  { %3242 = vrcp.f32 %v1810_v15  ;;  %v4466_v15 = vld [vmem:[#allocation28_spill] sm:$0xff] }
 0x4bb   :  { %3244 = vrcp.f32 %v1811_v20 }
 0x4c3   :  { %v3241_v40 = vpop.eup %3240 }
 0x4c4   :  { %v1822_v25 = vmul.f32 %v3241_v40, %v3239_v13  ;;  %v3243_v46 = vpop.eup %3242 }
 0x4c5   :  { %v3245_v42 = vpop.eup %3244 }
 0x4c6   :  { %v4094_v27 = vadd.f32 %v1822_v25, %v1821_v22 }
 0x4c8   :  { %3246 = vtanh.f32 %v4094_v27  ;;  %2680 = vst [vmem:[%s4397_s6 + $0x58] sm:$0xff] %v4094_v27 }
 0x4d2   :  { %v3247_v50 = vpop.eup %3246 }
 0x4d3   :  { %v1826_v51 = vmul.f32 %v3247_v50, %v3245_v42  ;;  %v1825_v53 = vmul.f32 %v3247_v50, %v3243_v46 }
 0x4d5   :  { %2678 = vst [vmem:[%s4397_s6 + $0x48] sm:$0xff] %v1826_v51  ;;  %2679 = vst [vmem:[%s4397_s6 + $0x50] sm:$0xff] %v1825_v53  ;;  %v1831_v17 = vpack.c.bf16 %v1825_v53, %v1825_v53 }
 0x4d7   :  { %1873 = vmatmul.mubr.bf16.vlgmr.msra.gmra.mrb[40].mxu1 %v1831_v17  ;;  %1914 = vmatmul.mubr.bf16.vlgmr.msra.gmra.mrb[56].mxu0 %v1831_v17 }
 0x4d8   :  { %2902 = vmatpush3.bf16.msra.mxu1 %v4107_v54  ;;  %2917 = vmatprep.mubr.msk.bf16.mxu1 %vm3422_vm0, %v4445_v19 }
 0x4d9   :  { %2903 = vmatprep.subr.bf16.mxu1 %v4445_v19  ;;  %2012 = vmatpush1.bf16.msra.mxu0 %v3929_v3 }
 0x4da   :  { %2013 = vmatprep.subr.bf16.mxu0 %v3932_v18  ;;  %2043 = vmatprep.mubr.bf16.mxu0 %v4446_v63 }
 0x4dc   :  { %2904 = vmatpush3.bf16.msra.mxu1 %v4116_v56 }
 0x4dd   :  { %2905 = vmatprep.subr.bf16.mxu1 %v4445_v19  ;;  %2014 = vmatpush1.bf16.msra.mxu0 %v4011_v30 }
 0x4de   :  { %2015 = vmatprep.subr.bf16.mxu0 %v4014_v45 }
 0x4e0   :  { %2906 = vmatpush3.bf16.msra.mxu1 %v4122_v57 }
 0x4e1   :  { %2907 = vmatprep.subr.bf16.mxu1 %v4445_v19  ;;  %2016 = vmatpush1.bf16.msra.mxu0 %v4019_v32 }
 0x4e2   :  { %2017 = vmatprep.subr.bf16.mxu0 %v4022_v35 }
 0x4e4   :  { %2908 = vmatpush3.bf16.msra.mxu1 %v4128_v26 }
 0x4e5   :  { %2909 = vmatprep.subr.bf16.mxu1 %v4445_v19  ;;  %2018 = vmatpush1.bf16.msra.mxu0 %v4027_v49 }
 0x4e6   :  { %2019 = vmatprep.subr.bf16.mxu0 %v4030_v37 }
 0x4e8   :  { %2910 = vmatpush3.bf16.msra.mxu1 %v4134_v59 }
 0x4e9   :  { %2911 = vmatprep.subr.bf16.mxu1 %v4445_v19  ;;  %2020 = vmatpush1.bf16.msra.mxu0 %v4035_v52 }
 0x4ea   :  { %2021 = vmatprep.subr.bf16.mxu0 %v4038_v39 }
 0x4ec   :  { %2912 = vmatpush3.bf16.msra.mxu1 %v4140_v31 }
 0x4ed   :  { %2913 = vmatprep.subr.bf16.mxu1 %v4445_v19  ;;  %2022 = vmatpush1.bf16.msra.mxu0 %v4043_v55 }
 0x4ee   :  { %2023 = vmatprep.subr.bf16.mxu0 %v4046_v41 }
 0x4f0   :  { %2914 = vmatpush3.bf16.msra.mxu1 %v4146_v60 }
 0x4f1   :  { %2915 = vmatprep.subr.bf16.mxu1 %v4445_v19  ;;  %2024 = vmatpush1.bf16.msra.mxu0 %v4051_v58 }
 0x4f2   :  { %2025 = vmatprep.subr.bf16.mxu0 %v4054_v44 }
 0x4f4   :  { %2916 = vmatpush3.bf16.msra.mxu1 %v4152_v38 }
 0x4f5   :  { %2052 = vmatprep.subr.bf16.mxu1 %v4058_v61  ;;  %2026 = vmatpush1.bf16.msra.mxu0 %v4061_v47 }
 0x4f6   :  { %2921 = vmatprep.subr.bf16.mxu0 %v4445_v19 }
 0x4f7   :  { %2918 = vmatmul.mubr.bf16.vlgmr.msra.gmra.mrb[44].mxu1 %v1831_v17 }
 0x4f8   :  { %2053 = vmatpush1.bf16.msra.mxu1 %v4065_v0  ;;  %2084 = vmatprep.mubr.bf16.mxu1 %v4446_v63 }
 0x4f9   :  { %2054 = vmatprep.subr.bf16.mxu1 %v4069_v48 }
 0x4fc   :  { %2055 = vmatpush1.bf16.msra.mxu1 %v4072_v4 }
 0x4fd   :  { %2056 = vmatprep.subr.bf16.mxu1 %v4162_v62 }
 0x500   :  { %2057 = vmatpush1.bf16.msra.mxu1 %v4165_v36 }
 0x501   :  { %2058 = vmatprep.subr.bf16.mxu1 %v4168_v5 }
 0x504   :  { %2059 = vmatpush1.bf16.msra.mxu1 %v4171_v9 }
 0x505   :  { %2060 = vmatprep.subr.bf16.mxu1 %v4174_v7 }
 0x508   :  { %2061 = vmatpush1.bf16.msra.mxu1 %v4177_v21 }
 0x509   :  { %2062 = vmatprep.subr.bf16.mxu1 %v4180_v34 }
 0x50c   :  { %2063 = vmatpush1.bf16.msra.mxu1 %v4183_v1 }
 0x50d   :  { %2064 = vmatprep.subr.bf16.mxu1 %v4186_v2 }
 0x510   :  { %2065 = vmatpush1.bf16.msra.mxu1 %v4189_v43 }
 0x511   :  { %2066 = vmatprep.subr.bf16.mxu1 %v4192_v6 }
 0x514   :  { %2067 = vmatpush1.bf16.msra.mxu1 %v4195_v29 }
 0x515   :  { %2182 = vmatprep.subr.bf16.mxu1 %v3980_v10 }
 0x5aa   :  { %v1874_v11 = vpop.f32.mrb[40].mxu1  ;;  %v1915_v8 = vpop.f32.mrb[56].mxu0 }
 0x5ab   :  { %v1962_v33 = vadd.f32 %v1874_v11, %v4463_v16  ;;  %v1964_v23 = vadd.f32 %v1915_v8, %v4464_v12  ;;  %v1876_v24 = vpop.f32.mrb[41].mxu1  ;;  %v1917_v28 = vpop.f32.mrb[57].mxu0 }
 0x5ac   :  { %v1963_v13 = vadd.f32 %v1876_v24, %v4465_v14  ;;  %v1965_v40 = vadd.f32 %v1917_v28, %v4466_v15  ;;  %v1878_v20 = vpop.f32.mrb[42].mxu1  ;;  %v1919_v22 = vpop.f32.mrb[58].mxu0  ;;  %v4467_v24 = vld [vmem:[#allocation41_spill] sm:$0xff] }
 0x5ad   :  { %v1879_v25 = vpop.f32.mrb[43].mxu1  ;;  %v1920_v46 = vpop.f32.mrb[59].mxu0  ;;  %v2681_v50 = vmul.f32 -1.442695, %v1962_v33  ;;  %v2683_v17 = vmul.f32 -1.442695, %v1964_v23 }
 0x5ae   :  { %v2682_v42 = vmul.f32 -1.442695, %v1963_v13  ;;  %v2684_v11 = vmul.f32 -1.442695, %v1965_v40 }
 0x5b0   :  { %3248 = vpow2.f32 %v2682_v42 }
 0x5b1   :  { %3250 = vpow2.f32 %v2681_v50 }
 0x5b2   :  { %3252 = vpow2.f32 %v2683_v17 }
 0x5b3   :  { %3254 = vpow2.f32 %v2684_v11 }
 0x5ba   :  { %v3249_v51 = vpop.eup %3248 }
 0x5bb   :  { %v3251_v53 = vpop.eup %3250  ;;  %v1980_v16 = vadd.f32 1.0, %v3249_v51 }
 0x5bc   :  { %v1979_v8 = vadd.f32 1.0, %v3251_v53  ;;  %v3253_v33 = vpop.eup %3252 }
 0x5bd   :  { %3256 = vrcp.f32 %v1980_v16  ;;  %v3255_v20 = vpop.eup %3254  ;;  %v1981_v46 = vadd.f32 1.0, %v3253_v33 }
 0x5be   :  { %3258 = vrcp.f32 %v1979_v8  ;;  %v1982_v40 = vadd.f32 1.0, %v3255_v20 }
 0x5c7   :  { %v3257_v22 = vpop.eup %3256 }
 0x5c8   :  { %v3259_v25 = vpop.eup %3258  ;;  %v1992_v42 = vmul.f32 %v3257_v22, %v4094_v27  ;;  %v4470_v22 = vld [vmem:[#allocation31_spill] sm:$0xff] }
 0x5ca   :  { %v1956_v12 = vpop.f32.mrb[44].mxu1 }
 0x5cb   :  { %v1966_v28 = vadd.f32 %v1956_v12, %v4467_v24  ;;  %v2919_v14 = vpop.f32.mrb[45].mxu1 }
 0x5cc   :  { %v1959_v15 = vpop.f32.mrb[46].mxu1 }
 0x5cd   :  { %3260 = vtanh.f32 %v1966_v28  ;;  %v2920_v13 = vpop.f32.mrb[47].mxu1  ;;  %v4468_v28 = vld [vmem:[#allocation29_spill] sm:$0xff]  ;;  %v4469_v15 = vld [vmem:[#allocation30_spill] sm:$0xff] }
 0x5ce   :  { %3262 = vrcp.f32 %v1981_v46  ;;  %v4471_v46 = vld [vmem:[#allocation32_spill] sm:$0xff] }
 0x5cf   :  { %3264 = vrcp.f32 %v1982_v40 }
 0x5d7   :  { %v3261_v23 = vpop.eup %3260 }
 0x5d8   :  { %v1993_v50 = vmul.f32 %v3261_v23, %v3259_v25  ;;  %v3263_v53 = vpop.eup %3262 }
 0x5d9   :  { %v3265_v17 = vpop.eup %3264 }
 0x5da   :  { %v4205_v51 = vadd.f32 %v1993_v50, %v1992_v42 }
 0x5dc   :  { %3266 = vtanh.f32 %v4205_v51  ;;  %2687 = vst [vmem:[%s4397_s6 + $0x70] sm:$0xff] %v4205_v51 }
 0x5e6   :  { %v3267_v11 = vpop.eup %3266 }
 0x5e7   :  { %v1997_v16 = vmul.f32 %v3267_v11, %v3265_v17  ;;  %v1996_v8 = vmul.f32 %v3267_v11, %v3263_v53 }
 0x5e9   :  { %2685 = vst [vmem:[%s4397_s6 + $0x60] sm:$0xff] %v1997_v16  ;;  %2686 = vst [vmem:[%s4397_s6 + $0x68] sm:$0xff] %v1996_v8  ;;  %v2002_v27 = vpack.c.bf16 %v1996_v8, %v1996_v8 }
 0x5eb   :  { %2044 = vmatmul.mubr.bf16.vlgmr.msra.gmra.mrb[60].mxu0 %v2002_v27  ;;  %2085 = vmatmul.mubr.bf16.vlgmr.msra.gmra.mrb[48].mxu1 %v2002_v27 }
 0x5ec   :  { %2922 = vmatpush3.bf16.msra.mxu0 %v4107_v54  ;;  %2937 = vmatprep.mubr.msk.bf16.mxu0 %vm3422_vm0, %v4445_v19 }
 0x5ed   :  { %2923 = vmatprep.subr.bf16.mxu0 %v4445_v19  ;;  %2183 = vmatpush1.bf16.msra.mxu1 %v3929_v3 }
 0x5ee   :  { %2184 = vmatprep.subr.bf16.mxu1 %v3932_v18  ;;  %2214 = vmatprep.mubr.bf16.mxu1 %v4446_v63 }
 0x5f0   :  { %2924 = vmatpush3.bf16.msra.mxu0 %v4116_v56 }
 0x5f1   :  { %2925 = vmatprep.subr.bf16.mxu0 %v4445_v19  ;;  %2185 = vmatpush1.bf16.msra.mxu1 %v4011_v30 }
 0x5f2   :  { %2186 = vmatprep.subr.bf16.mxu1 %v4014_v45 }
 0x5f4   :  { %2926 = vmatpush3.bf16.msra.mxu0 %v4122_v57 }
 0x5f5   :  { %2927 = vmatprep.subr.bf16.mxu0 %v4445_v19  ;;  %2187 = vmatpush1.bf16.msra.mxu1 %v4019_v32 }
 0x5f6   :  { %2188 = vmatprep.subr.bf16.mxu1 %v4022_v35 }
 0x5f8   :  { %2928 = vmatpush3.bf16.msra.mxu0 %v4128_v26 }
 0x5f9   :  { %2929 = vmatprep.subr.bf16.mxu0 %v4445_v19  ;;  %2189 = vmatpush1.bf16.msra.mxu1 %v4027_v49 }
 0x5fa   :  { %2190 = vmatprep.subr.bf16.mxu1 %v4030_v37 }
 0x5fc   :  { %2930 = vmatpush3.bf16.msra.mxu0 %v4134_v59 }
 0x5fd   :  { %2931 = vmatprep.subr.bf16.mxu0 %v4445_v19  ;;  %2191 = vmatpush1.bf16.msra.mxu1 %v4035_v52 }
 0x5fe   :  { %2192 = vmatprep.subr.bf16.mxu1 %v4038_v39 }
 0x600   :  { %2932 = vmatpush3.bf16.msra.mxu0 %v4140_v31 }
 0x601   :  { %2933 = vmatprep.subr.bf16.mxu0 %v4445_v19  ;;  %2193 = vmatpush1.bf16.msra.mxu1 %v4043_v55 }
 0x602   :  { %2194 = vmatprep.subr.bf16.mxu1 %v4046_v41 }
 0x604   :  { %2934 = vmatpush3.bf16.msra.mxu0 %v4146_v60 }
 0x605   :  { %2935 = vmatprep.subr.bf16.mxu0 %v4445_v19  ;;  %2195 = vmatpush1.bf16.msra.mxu1 %v4051_v58 }
 0x606   :  { %2196 = vmatprep.subr.bf16.mxu1 %v4054_v44 }
 0x608   :  { %2936 = vmatpush3.bf16.msra.mxu0 %v4152_v38 }
 0x609   :  { %2223 = vmatprep.subr.bf16.mxu0 %v4058_v61  ;;  %2197 = vmatpush1.bf16.msra.mxu1 %v4061_v47 }
 0x60a   :  { %2941 = vmatprep.subr.bf16.mxu1 %v4445_v19 }
 0x60b   :  { %2938 = vmatmul.mubr.bf16.vlgmr.msra.gmra.mrb[64].mxu0 %v2002_v27 }
 0x60c   :  { %2224 = vmatpush1.bf16.msra.mxu0 %v4065_v0  ;;  %2255 = vmatprep.mubr.bf16.mxu0 %v4446_v63 }
 0x60d   :  { %2225 = vmatprep.subr.bf16.mxu0 %v4069_v48 }
 0x610   :  { %2226 = vmatpush1.bf16.msra.mxu0 %v4072_v4 }
 0x611   :  { %2227 = vmatprep.subr.bf16.mxu0 %v4162_v62 }
 0x614   :  { %2228 = vmatpush1.bf16.msra.mxu0 %v4165_v36 }
 0x615   :  { %2229 = vmatprep.subr.bf16.mxu0 %v4168_v5 }
 0x618   :  { %2230 = vmatpush1.bf16.msra.mxu0 %v4171_v9 }
 0x619   :  { %2231 = vmatprep.subr.bf16.mxu0 %v4174_v7 }
 0x61c   :  { %2232 = vmatpush1.bf16.msra.mxu0 %v4177_v21 }
 0x61d   :  { %2233 = vmatprep.subr.bf16.mxu0 %v4180_v34 }
 0x620   :  { %2234 = vmatpush1.bf16.msra.mxu0 %v4183_v1 }
 0x621   :  { %2235 = vmatprep.subr.bf16.mxu0 %v4186_v2 }
 0x624   :  { %2236 = vmatpush1.bf16.msra.mxu0 %v4189_v43 }
 0x625   :  { %2237 = vmatprep.subr.bf16.mxu0 %v4192_v6 }
 0x628   :  { %2238 = vmatpush1.bf16.msra.mxu0 %v4195_v29 }
 0x629   :  { %2353 = vmatprep.subr.bf16.mxu0 %v3980_v10 }
 0x6be   :  { %v2045_v12 = vpop.f32.mrb[60].mxu0  ;;  %v2086_v24 = vpop.f32.mrb[48].mxu1 }
 0x6bf   :  { %v2133_v14 = vadd.f32 %v2045_v12, %v4468_v28  ;;  %v2135_v13 = vadd.f32 %v2086_v24, %v4469_v15  ;;  %v2047_v33 = vpop.f32.mrb[61].mxu0  ;;  %v2088_v20 = vpop.f32.mrb[49].mxu1  ;;  %v4472_v15 = vld [vmem:[#allocation42_spill] sm:$0xff] }
 0x6c0   :  { %v2134_v25 = vadd.f32 %v2047_v33, %v4470_v22  ;;  %v2136_v23 = vadd.f32 %v2088_v20, %v4471_v46  ;;  %v2049_v40 = vpop.f32.mrb[62].mxu0  ;;  %v2090_v42 = vpop.f32.mrb[50].mxu1 }
 0x6c1   :  { %v2050_v50 = vpop.f32.mrb[63].mxu0  ;;  %v2091_v53 = vpop.f32.mrb[51].mxu1  ;;  %v2688_v11 = vmul.f32 -1.442695, %v2133_v14  ;;  %v2690_v8 = vmul.f32 -1.442695, %v2135_v13 }
 0x6c2   :  { %v2689_v17 = vmul.f32 -1.442695, %v2134_v25  ;;  %v2691_v27 = vmul.f32 -1.442695, %v2136_v23 }
 0x6c4   :  { %3268 = vpow2.f32 %v2689_v17 }
 0x6c5   :  { %3270 = vpow2.f32 %v2688_v11 }
 0x6c6   :  { %3272 = vpow2.f32 %v2690_v8 }
 0x6c7   :  { %3274 = vpow2.f32 %v2691_v27 }
 0x6ce   :  { %v3269_v10 = vpop.eup %3268 }
 0x6cf   :  { %v3271_v16 = vpop.eup %3270  ;;  %v2151_v12 = vadd.f32 1.0, %v3269_v10 }
 0x6d0   :  { %v2150_v24 = vadd.f32 1.0, %v3271_v16  ;;  %v3273_v14 = vpop.eup %3272 }
 0x6d1   :  { %3276 = vrcp.f32 %v2151_v12  ;;  %v3275_v46 = vpop.eup %3274  ;;  %v2152_v50 = vadd.f32 1.0, %v3273_v14 }
 0x6d2   :  { %3278 = vrcp.f32 %v2150_v24  ;;  %v2153_v23 = vadd.f32 1.0, %v3275_v46 }
 0x6db   :  { %v3277_v40 = vpop.eup %3276 }
 0x6dc   :  { %v3279_v42 = vpop.eup %3278  ;;  %v2163_v53 = vmul.f32 %v3277_v40, %v4205_v51 }
 0x6de   :  { %v2127_v28 = vpop.f32.mrb[64].mxu0 }
 0x6df   :  { %v2137_v33 = vadd.f32 %v2127_v28, %v4472_v15  ;;  %v2939_v20 = vpop.f32.mrb[65].mxu0 }
 0x6e0   :  { %v2130_v22 = vpop.f32.mrb[66].mxu0 }
 0x6e1   :  { %3280 = vtanh.f32 %v2137_v33  ;;  %v2940_v25 = vpop.f32.mrb[67].mxu0 }
 0x6e2   :  { %3282 = vrcp.f32 %v2152_v50 }
 0x6e3   :  { %3284 = vrcp.f32 %v2153_v23 }
 0x6eb   :  { %v3281_v13 = vpop.eup %3280 }
 0x6ec   :  { %v2164_v17 = vmul.f32 %v3281_v13, %v3279_v42  ;;  %v3283_v10 = vpop.eup %3282 }
 0x6ed   :  { %v3285_v16 = vpop.eup %3284 }
 0x6ee   :  { %v4276_v11 = vadd.f32 %v2164_v17, %v2163_v53  ;;  %v4479_v53 = vld [vmem:[#allocation38_spill] sm:$0xff] }
 0x6f0   :  { %3286 = vtanh.f32 %v4276_v11  ;;  %2694 = vst [vmem:[%s4397_s6 + $0x88] sm:$0xff] %v4276_v11 }
 0x6fa   :  { %v3287_v8 = vpop.eup %3286 }
 0x6fb   :  { %v2168_v27 = vmul.f32 %v3287_v8, %v3285_v16  ;;  %v2167_v12 = vmul.f32 %v3287_v8, %v3283_v10  ;;  %v4480_v10 = vld [vmem:[#allocation39_spill] sm:$0xff] }
 0x6fd   :  { %2692 = vst [vmem:[%s4397_s6 + $0x78] sm:$0xff] %v2168_v27  ;;  %2693 = vst [vmem:[%s4397_s6 + $0x80] sm:$0xff] %v2167_v12  ;;  %v2173_v51 = vpack.c.bf16 %v2167_v12, %v2167_v12 }
 0x6ff   :  { %2215 = vmatmul.mubr.bf16.vlgmr.msra.gmra.mrb[52].mxu1 %v2173_v51  ;;  %2256 = vmatmul.mubr.bf16.vlgmr.msra.gmra.mrb[68].mxu0 %v2173_v51 }
 0x700   :  { %2942 = vmatpush3.bf16.msra.mxu1 %v4107_v54  ;;  %2957 = vmatprep.mubr.msk.bf16.mxu1 %vm3422_vm0, %v4445_v19 }
 0x701   :  { %2943 = vmatprep.subr.bf16.mxu1 %v4445_v19  ;;  %2354 = vmatpush1.bf16.msra.mxu0 %v3929_v3 }
 0x702   :  { %2355 = vmatprep.subr.bf16.mxu0 %v3932_v18  ;;  %2385 = vmatprep.mubr.bf16.mxu0 %v4446_v63  ;;  %v4473_v18 = vld [vmem:[#allocation33_spill] sm:$0xff] }
 0x704   :  { %2944 = vmatpush3.bf16.msra.mxu1 %v4116_v56 }
 0x705   :  { %2945 = vmatprep.subr.bf16.mxu1 %v4445_v19  ;;  %2356 = vmatpush1.bf16.msra.mxu0 %v4011_v30 }
 0x706   :  { %2357 = vmatprep.subr.bf16.mxu0 %v4014_v45  ;;  %v4474_v45 = vld [vmem:[#allocation34_spill] sm:$0xff] }
 0x708   :  { %2946 = vmatpush3.bf16.msra.mxu1 %v4122_v57 }
 0x709   :  { %2947 = vmatprep.subr.bf16.mxu1 %v4445_v19  ;;  %2358 = vmatpush1.bf16.msra.mxu0 %v4019_v32 }
 0x70a   :  { %2359 = vmatprep.subr.bf16.mxu0 %v4022_v35 }
 0x70c   :  { %2948 = vmatpush3.bf16.msra.mxu1 %v4128_v26 }
 0x70d   :  { %2949 = vmatprep.subr.bf16.mxu1 %v4445_v19  ;;  %2360 = vmatpush1.bf16.msra.mxu0 %v4027_v49 }
 0x70e   :  { %2361 = vmatprep.subr.bf16.mxu0 %v4030_v37  ;;  %v4475_v37 = vld [vmem:[#allocation35_spill] sm:$0xff] }
 0x710   :  { %2950 = vmatpush3.bf16.msra.mxu1 %v4134_v59 }
 0x711   :  { %2951 = vmatprep.subr.bf16.mxu1 %v4445_v19  ;;  %2362 = vmatpush1.bf16.msra.mxu0 %v4035_v52 }
 0x712   :  { %2363 = vmatprep.subr.bf16.mxu0 %v4038_v39  ;;  %v4476_v39 = vld [vmem:[#allocation36_spill] sm:$0xff] }
 0x714   :  { %2952 = vmatpush3.bf16.msra.mxu1 %v4140_v31 }
 0x715   :  { %2953 = vmatprep.subr.bf16.mxu1 %v4445_v19  ;;  %2364 = vmatpush1.bf16.msra.mxu0 %v4043_v55 }
 0x716   :  { %2365 = vmatprep.subr.bf16.mxu0 %v4046_v41 }
 0x718   :  { %2954 = vmatpush3.bf16.msra.mxu1 %v4146_v60 }
 0x719   :  { %2955 = vmatprep.subr.bf16.mxu1 %v4445_v19  ;;  %2366 = vmatpush1.bf16.msra.mxu0 %v4051_v58 }
 0x71a   :  { %2367 = vmatprep.subr.bf16.mxu0 %v4054_v44 }
 0x71c   :  { %2956 = vmatpush3.bf16.msra.mxu1 %v4152_v38 }
 0x71d   :  { %2394 = vmatprep.subr.bf16.mxu1 %v4058_v61  ;;  %2368 = vmatpush1.bf16.msra.mxu0 %v4061_v47 }
 0x71e   :  { %2961 = vmatprep.subr.bf16.mxu0 %v4445_v19 }
 0x71f   :  { %2958 = vmatmul.mubr.bf16.vlgmr.msra.gmra.mrb[56].mxu1 %v2173_v51 }
 0x720   :  { %2395 = vmatpush1.bf16.msra.mxu1 %v4065_v0  ;;  %2426 = vmatprep.mubr.bf16.mxu1 %v4446_v63 }
 0x721   :  { %2396 = vmatprep.subr.bf16.mxu1 %v4069_v48 }
 0x724   :  { %2397 = vmatpush1.bf16.msra.mxu1 %v4072_v4 }
 0x725   :  { %2398 = vmatprep.subr.bf16.mxu1 %v4162_v62 }
 0x728   :  { %2399 = vmatpush1.bf16.msra.mxu1 %v4165_v36 }
 0x729   :  { %2400 = vmatprep.subr.bf16.mxu1 %v4168_v5 }
 0x72c   :  { %2401 = vmatpush1.bf16.msra.mxu1 %v4171_v9 }
 0x72d   :  { %2402 = vmatprep.subr.bf16.mxu1 %v4174_v7 }
 0x730   :  { %2403 = vmatpush1.bf16.msra.mxu1 %v4177_v21  ;;  %v4477_v21 = vld [vmem:[#allocation43_spill] sm:$0xff] }
 0x731   :  { %2404 = vmatprep.subr.bf16.mxu1 %v4180_v34 }
 0x734   :  { %2405 = vmatpush1.bf16.msra.mxu1 %v4183_v1 }
 0x735   :  { %2406 = vmatprep.subr.bf16.mxu1 %v4186_v2 }
 0x738   :  { %2407 = vmatpush1.bf16.msra.mxu1 %v4189_v43 }
 0x739   :  { %2408 = vmatprep.subr.bf16.mxu1 %v4192_v6 }
 0x73c   :  { %2409 = vmatpush1.bf16.msra.mxu1 %v4195_v29 }
 0x7d2   :  { %v2216_v63 = vpop.f32.mrb[52].mxu1  ;;  %v2257_v3 = vpop.f32.mrb[68].mxu0 }
 0x7d3   :  { %v2304_v30 = vadd.f32 %v2216_v63, %v4473_v18  ;;  %v2306_v32 = vadd.f32 %v2257_v3, %v4474_v45  ;;  %v2218_v35 = vpop.f32.mrb[53].mxu1  ;;  %v2259_v49 = vpop.f32.mrb[69].mxu0 }
 0x7d4   :  { %v2305_v52 = vadd.f32 %v2218_v35, %v4475_v37  ;;  %v2307_v55 = vadd.f32 %v2259_v49, %v4476_v39  ;;  %v2220_v41 = vpop.f32.mrb[54].mxu1  ;;  %v2261_v58 = vpop.f32.mrb[70].mxu0  ;;  %v4482_v49 = vld [vmem:[#allocation44_spill] sm:$0xff] }
 0x7d5   :  { %v2221_v44 = vpop.f32.mrb[55].mxu1  ;;  %v2262_v61 = vpop.f32.mrb[71].mxu0  ;;  %v2695_v0 = vmul.f32 -1.442695, %v2304_v30  ;;  %v2697_v62 = vmul.f32 -1.442695, %v2306_v32 }
 0x7d6   :  { %v2696_v47 = vmul.f32 -1.442695, %v2305_v52  ;;  %v2698_v36 = vmul.f32 -1.442695, %v2307_v55 }
 0x7d8   :  { %3288 = vpow2.f32 %v2696_v47 }
 0x7d9   :  { %3290 = vpow2.f32 %v2695_v0 }
 0x7da   :  { %3292 = vpow2.f32 %v2697_v62 }
 0x7db   :  { %3294 = vpow2.f32 %v2698_v36 }
 0x7e2   :  { %v3289_v48 = vpop.eup %3288 }
 0x7e3   :  { %v3291_v4 = vpop.eup %3290  ;;  %v2322_v5 = vadd.f32 1.0, %v3289_v48 }
 0x7e4   :  { %v2321_v9 = vadd.f32 1.0, %v3291_v4  ;;  %v3293_v6 = vpop.eup %3292 }
 0x7e5   :  { %3296 = vrcp.f32 %v2322_v5  ;;  %v3295_v29 = vpop.eup %3294  ;;  %v2323_v15 = vadd.f32 1.0, %v3293_v6 }
 0x7e6   :  { %3298 = vrcp.f32 %v2321_v9  ;;  %v2324_v20 = vadd.f32 1.0, %v3295_v29 }
 0x7ef   :  { %v3297_v24 = vpop.eup %3296 }
 0x7f0   :  { %v3299_v28 = vpop.eup %3298  ;;  %v2334_v22 = vmul.f32 %v3297_v24, %v4276_v11 }
 0x7f2   :  { %v2298_v7 = vpop.f32.mrb[56].mxu1 }
 0x7f3   :  { %v2308_v34 = vadd.f32 %v2298_v7, %v4477_v21  ;;  %v2959_v1 = vpop.f32.mrb[57].mxu1 }
 0x7f4   :  { %v2301_v2 = vpop.f32.mrb[58].mxu1 }
 0x7f5   :  { %3300 = vtanh.f32 %v2308_v34  ;;  %v2960_v43 = vpop.f32.mrb[59].mxu1 }
 0x7f6   :  { %3302 = vrcp.f32 %v2323_v15 }
 0x7f7   :  { %3304 = vrcp.f32 %v2324_v20 }
 0x7ff   :  { %v3301_v33 = vpop.eup %3300 }
 0x800   :  { %v2335_v25 = vmul.f32 %v3301_v33, %v3299_v28  ;;  %v3303_v46 = vpop.eup %3302 }
 0x801   :  { %v3305_v40 = vpop.eup %3304 }
 0x802   :  { %v4346_v14 = vadd.f32 %v2335_v25, %v2334_v22 }
 0x804   :  { %3306 = vtanh.f32 %v4346_v14  ;;  %2701 = vst [vmem:[%s4397_s6 + $0xa0] sm:$0xff] %v4346_v14 }
 0x80e   :  { %v3307_v42 = vpop.eup %3306 }
 0x80f   :  { %v2339_v50 = vmul.f32 %v3307_v42, %v3305_v40  ;;  %v2338_v13 = vmul.f32 %v3307_v42, %v3303_v46 }
 0x811   :  { %2699 = vst [vmem:[%s4397_s6 + $0x90] sm:$0xff] %v2339_v50  ;;  %2700 = vst [vmem:[%s4397_s6 + $0x98] sm:$0xff] %v2338_v13  ;;  %v2344_v23 = vpack.c.bf16 %v2338_v13, %v2338_v13 }
 0x813   :  { %2386 = vmatmul.mubr.bf16.vlgmr.msra.gmra.mrb[72].mxu0 %v2344_v23  ;;  %2427 = vmatmul.mubr.bf16.vlgmr.msra.gmra.mrb[60].mxu1 %v2344_v23 }
 0x814   :  { %2962 = vmatpush3.bf16.msra.mxu0 %v4107_v54  ;;  %2977 = vmatprep.mubr.msk.bf16.mxu0 %vm3422_vm0, %v4445_v19 }
 0x815   :  { %2963 = vmatprep.subr.bf16.mxu0 %v4445_v19 }
 0x818   :  { %2964 = vmatpush3.bf16.msra.mxu0 %v4116_v56 }
 0x819   :  { %2965 = vmatprep.subr.bf16.mxu0 %v4445_v19 }
 0x81c   :  { %2966 = vmatpush3.bf16.msra.mxu0 %v4122_v57  ;;  %v4478_v57 = vld [vmem:[#allocation37_spill] sm:$0xff] }
 0x81d   :  { %2967 = vmatprep.subr.bf16.mxu0 %v4445_v19 }
 0x820   :  { %2968 = vmatpush3.bf16.msra.mxu0 %v4128_v26 }
 0x821   :  { %2969 = vmatprep.subr.bf16.mxu0 %v4445_v19 }
 0x824   :  { %2970 = vmatpush3.bf16.msra.mxu0 %v4134_v59 }
 0x825   :  { %2971 = vmatprep.subr.bf16.mxu0 %v4445_v19 }
 0x828   :  { %2972 = vmatpush3.bf16.msra.mxu0 %v4140_v31  ;;  %v4481_v31 = vld [vmem:[#allocation40_spill] sm:$0xff] }
 0x829   :  { %2973 = vmatprep.subr.bf16.mxu0 %v4445_v19 }
 0x82c   :  { %2974 = vmatpush3.bf16.msra.mxu0 %v4146_v60 }
 0x82d   :  { %2975 = vmatprep.subr.bf16.mxu0 %v4445_v19 }
 0x830   :  { %2976 = vmatpush3.bf16.msra.mxu0 %v4152_v38 }
 0x833   :  { %2978 = vmatmul.mubr.bf16.vlgmr.msra.gmra.mrb[76].mxu0 %v2344_v23 }
 0x8e6   :  { %v2387_v54 = vpop.f32.mrb[72].mxu0  ;;  %v2428_v56 = vpop.f32.mrb[60].mxu1 }
 0x8e7   :  { %v2475_v26 = vadd.f32 %v2387_v54, %v4478_v57  ;;  %v2477_v17 = vadd.f32 %v2428_v56, %v4479_v53  ;;  %v2389_v59 = vpop.f32.mrb[73].mxu0  ;;  %v2430_v11 = vpop.f32.mrb[61].mxu1 }
 0x8e8   :  { %v2476_v16 = vadd.f32 %v2389_v59, %v4480_v10  ;;  %v2478_v8 = vadd.f32 %v2430_v11, %v4481_v31  ;;  %v2391_v27 = vpop.f32.mrb[74].mxu0  ;;  %v2432_v12 = vpop.f32.mrb[62].mxu1 }
 0x8e9   :  { %v2392_v60 = vpop.f32.mrb[75].mxu0  ;;  %v2433_v51 = vpop.f32.mrb[63].mxu1  ;;  %v2702_v63 = vmul.f32 -1.442695, %v2475_v26  ;;  %v2704_v18 = vmul.f32 -1.442695, %v2477_v17 }
 0x8ea   :  { %v2703_v19 = vmul.f32 -1.442695, %v2476_v16  ;;  %v2705_v30 = vmul.f32 -1.442695, %v2478_v8 }
 0x8ec   :  { %3308 = vpow2.f32 %v2703_v19 }
 0x8ed   :  { %3310 = vpow2.f32 %v2702_v63 }
 0x8ee   :  { %3312 = vpow2.f32 %v2704_v18 }
 0x8ef   :  { %3314 = vpow2.f32 %v2705_v30 }
 0x8f6   :  { %v3309_v38 = vpop.eup %3308 }
 0x8f7   :  { %v3311_v3 = vpop.eup %3310  ;;  %v2493_v45 = vadd.f32 1.0, %v3309_v38 }
 0x8f8   :  { %v2492_v32 = vadd.f32 1.0, %v3311_v3  ;;  %v3313_v41 = vpop.eup %3312 }
 0x8f9   :  { %3316 = vrcp.f32 %v2493_v45  ;;  %v3315_v58 = vpop.eup %3314  ;;  %v2494_v47 = vadd.f32 1.0, %v3313_v41 }
 0x8fa   :  { %3318 = vrcp.f32 %v2492_v32  ;;  %v2495_v48 = vadd.f32 1.0, %v3315_v58 }
 0x903   :  { %v3317_v44 = vpop.eup %3316 }
 0x904   :  { %v3319_v61 = vpop.eup %3318  ;;  %v2505_v4 = vmul.f32 %v3317_v44, %v4346_v14 }
 0x906   :  { %v2469_v35 = vpop.f32.mrb[76].mxu0 }
 0x907   :  { %v2479_v37 = vadd.f32 %v2469_v35, %v4482_v49  ;;  %v2979_v52 = vpop.f32.mrb[77].mxu0 }
 0x908   :  { %v2472_v39 = vpop.f32.mrb[78].mxu0 }
 0x909   :  { %3320 = vtanh.f32 %v2479_v37  ;;  %v2980_v55 = vpop.f32.mrb[79].mxu0 }
 0x90a   :  { %3322 = vrcp.f32 %v2494_v47 }
 0x90b   :  { %3324 = vrcp.f32 %v2495_v48 }
 0x913   :  { %v3321_v0 = vpop.eup %3320 }
 0x914   :  { %v2506_v62 = vmul.f32 %v3321_v0, %v3319_v61  ;;  %v3323_v5 = vpop.eup %3322 }
 0x915   :  { %v3325_v9 = vpop.eup %3324 }
 0x916   :  { %v2507_v36 = vadd.f32 %v2506_v62, %v2505_v4 }
 0x918   :  { %3326 = vtanh.f32 %v2507_v36  ;;  %2708 = vst [vmem:[%s4397_s6 + $0xb8] sm:$0xff] %v2507_v36 }
 0x922   :  { %v3327_v7 = vpop.eup %3326 }
 0x923   :  { %v2509_v21 = vmul.f32 %v3327_v7, %v3323_v5  ;;  %v2510_v34 = vmul.f32 %v3327_v7, %v3325_v9 }
 0x925   :  { %2706 = vst [vmem:[%s4397_s6 + $0xa8] sm:$0xff] %v2510_v34  ;;  %2707 = vst [vmem:[%s4397_s6 + $0xb0] sm:$0xff] %v2509_v21 }
 0x926   :  { %2519 = vsyncpa [#allocation4], 1 }
 0x927   :  { %2520 = vsyncpa [#allocation6], 1 }

</bundles_post_ra>
